<compile_context>
chip_gen: v5e
topology: v5e:2x2
jax: 0.10.0
libtpu: 0.0.40
codegen_flags: <defaults>
</compile_context>

<pallas_src>
import functools

import jax
import jax.numpy as jnp
import numpy as np
from jax import lax
from jax.experimental import pallas as pl
from jax.experimental.pallas import tpu as pltpu


def _is_pow2(n):
    return n > 0 and (n & (n - 1)) == 0


# ----------------------------------------------------------------------------
# Pallas kernel body (single grid step: whole batch folded into the lane axis)
# ----------------------------------------------------------------------------
def _conv_film_body(refs, *, C_pad, C_out, K, dilation, T, F, B, pool,
                    use_film, eps):
    idx = 0
    x_ref = refs[idx]; idx += 1           # (C_pad, L)          channels x (b,t,f)
    w_ref = refs[idx]; idx += 1           # (C_out, K*K*C_pad)  im2col weights
    b_ref = refs[idx]; idx += 1           # (C_out, 1)          conv bias
    if use_film:
        fa_ref = refs[idx]; idx += 1      # (C_out, F)          FiLM scale
        fb_ref = refs[idx]; idx += 1      # (C_out, F)          FiLM shift
    if pool is not None:
        dsel_ref = refs[idx]; idx += 1    # (L, L_out)          one-hot down-select
    o_ref = refs[idx]; idx += 1           # (C_out, L_out)

    d = dilation
    pad = d * (K - 1) // 2                # PyTorch 'same' (odd kernel)
    L = B * T * F

    # lane -> (t, f) decomposition with shifts/masks (no float div/mod).
    lane = lax.broadcasted_iota(jnp.int32, (1, L), 1)
    if _is_pow2(F) and _is_pow2(T):
        f_lane = lane & (F - 1)
        t_lane = (lane >> (F.bit_length() - 1)) & (T - 1)
    else:  # TODO(synk): non-power-of-two spatial dims fall back to int div/mod.
        f_lane = lane % F
        t_lane = (lane // F) % T

    # ---- convolution: K*K rolled taps accumulated on the MXU ---------------
    # Each tap: roll whole slab by the flat source offset (XLU), zero the lanes
    # whose source falls outside the 'same' border (the mask also prevents any
    # cross-batch contamination of the folded lane axis), tiny (C_out,8)x(8,L)
    # matmul.  Bias is folded into the accumulator init.
    xv = x_ref[...]
    acc = jnp.broadcast_to(b_ref[...], (C_out, L)).astype(jnp.float32)
    for kh in range(K):
        dt = kh * d - pad
        for kw in range(K):
            df = kw * d - pad
            off = dt * F + df
            tap = kh * K + kw
            blk = pltpu.roll(xv, (-off) % L, axis=1) if (off % L) != 0 else xv
            conds = []
            if dt > 0:
                conds.append(t_lane < T - dt)
            if dt < 0:
                conds.append(t_lane >= -dt)
            if df > 0:
                conds.append(f_lane < F - df)
            if df < 0:
                conds.append(f_lane >= -df)
            if conds:
                valid = functools.reduce(jnp.logical_and, conds)
                blk = jnp.where(valid, blk, 0.0)
            w_tap = w_ref[:, tap * C_pad:(tap + 1) * C_pad]        # (C_out, C_pad)
            acc = acc + jnp.dot(w_tap, blk, preferred_element_type=jnp.float32)

    y = jnp.maximum(acc, 0.0)                                      # ReLU

    # ---- FiLM: broadcast (C_out, F) params to (C_out, L) via MXU -----------
    if use_film:
        f_sub = lax.broadcasted_iota(jnp.int32, (F, L), 0)
        rep = (f_sub == f_lane).astype(jnp.float32)                # (F, L)
        a_full = jnp.dot(fa_ref[...], rep, preferred_element_type=jnp.float32)
        s_full = jnp.dot(fb_ref[...], rep, preferred_element_type=jnp.float32)
        y = y * a_full + s_full

    # ---- MaxPool2d(p): lane-rolled window max + one down-select matmul -----
    if pool is not None:
        p = pool
        m = y
        for j in range(1, p):                                      # max along f
            m = jnp.maximum(m, pltpu.roll(y, (-j) % L, axis=1))
        m2 = m
        for i in range(1, p):                                      # max along t
            m2 = jnp.maximum(m2, pltpu.roll(m, (-(i * F)) % L, axis=1))
        # pick the window top-left lanes, compacted to (C_out, B*S_out)
        y = jnp.dot(m2, dsel_ref[...], preferred_element_type=jnp.float32)

    # ---- InstanceNorm2d (affine=False): per-(batch, channel) two-pass -------
    L_out = y.shape[1]
    S_out = L_out // B
    lane_o = lax.broadcasted_iota(jnp.int32, (1, L_out), 1)
    segs = [jnp.logical_and(lane_o >= b * S_out, lane_o < (b + 1) * S_out)
            for b in range(B)]
    inv_n = 1.0 / S_out
    mean_full = jnp.zeros_like(y)
    for b in range(B):
        mean_b = jnp.sum(jnp.where(segs[b], y, 0.0), axis=1,
                         keepdims=True) * inv_n
        mean_full = jnp.where(segs[b], mean_b, mean_full)
    cent = y - mean_full
    var_full = jnp.zeros_like(y)
    for b in range(B):
        var_b = jnp.sum(jnp.where(segs[b], cent * cent, 0.0), axis=1,
                        keepdims=True) * inv_n
        var_full = jnp.where(segs[b], var_b, var_full)
    o_ref[...] = (cent * lax.rsqrt(var_full + eps)).astype(o_ref.dtype)


# ----------------------------------------------------------------------------
# Glue: FiLM parameter evaluation (tiny MLP over n_f pitch positions)
# ----------------------------------------------------------------------------
def _film_scale_shift(params, n_f):
    pitch = (jnp.arange(n_f, dtype=jnp.float32) / n_f)[:, None]   # (n_f, 1)

    def mlp(w1, b1, w2, b2):
        h = jnp.maximum(pitch @ w1 + b1, 0.0)
        return h @ w2 + b2                                        # (n_f, C_out)

    alpha = mlp(*params["film_alpha"]).T                          # (C_out, n_f)
    beta = mlp(*params["film_beta"]).T
    return alpha.astype(jnp.float32), beta.astype(jnp.float32)


# ----------------------------------------------------------------------------
# Wrapper: layout plumbing + pallas_call
# ----------------------------------------------------------------------------
def conv_film_block(x, params, *, kernel_size, dilation, pool_size, use_film,
                    n_f, eps=1e-5):
    B, C_in, T, F = x.shape
    assert F == n_f, "FiLM requires the last (freq) axis to equal n_f"
    conv_w = params["conv_w"]
    C_out = conv_w.shape[0]
    K, d, p = kernel_size, dilation, pool_size
    assert K % 2 == 1, "padding='same' here assumes an odd kernel size"
    if p is not None:
        assert T % p == 0 and F % p == 0, "pool_size must divide T and F"
        T_out, F_out = T // p, F // p
    else:
        T_out, F_out = T, F
    S_out = T_out * F_out
    L, L_out = B * T * F, B * S_out
    C_pad = max(8, -(-C_in // 8) * 8)      # tap blocks padded to full sublanes

    # Layout plumbing only (tiny copies): channels-major slab with batch folded
    # into the lane axis, channel dim zero-padded to 8 sublanes.
    x_slab = jnp.transpose(x, (1, 0, 2, 3)).reshape(C_in, L).astype(jnp.float32)
    x_slab = jnp.pad(x_slab, ((0, C_pad - C_in), (0, 0)))
    # Conv weights as (C_out, K*K*C_pad), tap-major columns (kh, kw, ci_pad).
    wmat = jnp.transpose(conv_w, (0, 2, 3, 1)).astype(jnp.float32)
    wmat = jnp.pad(wmat, ((0, 0), (0, 0), (0, 0), (0, C_pad - C_in)))
    wmat = wmat.reshape(C_out, K * K * C_pad)
    bias = params["conv_b"].astype(jnp.float32).reshape(C_out, 1)

    inputs = [x_slab, wmat, bias]
    in_specs = [
        pl.BlockSpec((C_pad, L), lambda i: (0, 0)),
        pl.BlockSpec((C_out, K * K * C_pad), lambda i: (0, 0)),
        pl.BlockSpec((C_out, 1), lambda i: (0, 0)),
    ]
    if use_film:
        alpha, beta = _film_scale_shift(params, n_f)              # (C_out, F)
        inputs += [alpha, beta]
        in_specs += [pl.BlockSpec((C_out, F), lambda i: (0, 0))] * 2
    if p is not None:
        # One-hot down-select matrix (window top-left lane -> pooled lane),
        # precomputed once on the host (constant, loaded once).
        dsel = np.zeros((L, L_out), np.float32)
        for b in range(B):
            for to in range(T_out):
                for fo in range(F_out):
                    dsel[b * T * F + (to * p) * F + fo * p,
                         b * S_out + to * F_out + fo] = 1.0
        inputs.append(jnp.asarray(dsel))
        in_specs.append(pl.BlockSpec((L, L_out), lambda i: (0, 0)))

    cfg = dict(C_pad=C_pad, C_out=C_out, K=K, dilation=d, T=T, F=F, B=B,
               pool=p, use_film=use_film, eps=eps)

    def kernel(*refs):
        _conv_film_body(refs, **cfg)

    out = pl.pallas_call(
        kernel,
        out_shape=jax.ShapeDtypeStruct((C_out, L_out), jnp.float32),
        grid=(1,),
        in_specs=in_specs,
        out_specs=pl.BlockSpec((C_out, L_out), lambda i: (0, 0)),
        compiler_params=pltpu.CompilerParams(
            dimension_semantics=("arbitrary",),
            vmem_limit_bytes=32 * 1024 * 1024),
    )(*inputs)
    # lane-dense (C_out, B*S_out) slab back to NCHW (free layout plumbing)
    out = out.reshape(C_out, B, T_out, F_out)
    return jnp.transpose(out, (1, 0, 2, 3))


# ----------------------------------------------------------------------------
# Pure-JAX reference (mirrors the PyTorch forward semantics)
# ----------------------------------------------------------------------------
def reference(x, params, *, kernel_size, dilation, pool_size, use_film, n_f,
              eps=1e-5):
    K, d, p = kernel_size, dilation, pool_size
    pad = d * (K - 1) // 2
    y = lax.conv_general_dilated(
        x, params["conv_w"], window_strides=(1, 1),
        padding=[(pad, pad), (pad, pad)], rhs_dilation=(d, d),
        dimension_numbers=("NCHW", "OIHW", "NCHW"))
    y = y + params["conv_b"][None, :, None, None]
    y = jnp.maximum(y, 0.0)
    if use_film:
        alpha, beta = _film_scale_shift(params, n_f)              # (C, n_f)
        y = y * alpha[None, :, None, :] + beta[None, :, None, :]
    if p is not None:
        y = lax.reduce_window(y, -jnp.inf, lax.max,
                              (1, 1, p, p), (1, 1, p, p), "VALID")
    mean = jnp.mean(y, axis=(2, 3), keepdims=True)
    var = jnp.mean((y - mean) ** 2, axis=(2, 3), keepdims=True)
    return (y - mean) / jnp.sqrt(var + eps)


if __name__ == "__main__":
    B, C_in, C_out = 2, 4, 8
    T = F = n_f = 16
    K, d, p, hidden = 3, 1, 2, 16

    key = jax.random.PRNGKey(0)
    ks = jax.random.split(key, 12)
    params = {
        "conv_w": 0.2 * jax.random.normal(ks[0], (C_out, C_in, K, K), jnp.float32),
        "conv_b": 0.1 * jax.random.normal(ks[1], (C_out,), jnp.float32),
        "film_alpha": (
            0.5 * jax.random.normal(ks[2], (1, hidden), jnp.float32),
            0.1 * jax.random.normal(ks[3], (hidden,), jnp.float32),
            0.5 * jax.random.normal(ks[4], (hidden, C_out), jnp.float32),
            0.1 * jax.random.normal(ks[5], (C_out,), jnp.float32),
        ),
        "film_beta": (
            0.5 * jax.random.normal(ks[6], (1, hidden), jnp.float32),
            0.1 * jax.random.normal(ks[7], (hidden,), jnp.float32),
            0.5 * jax.random.normal(ks[8], (hidden, C_out), jnp.float32),
            0.1 * jax.random.normal(ks[9], (C_out,), jnp.float32),
        ),
    }
    x = jax.random.normal(ks[10], (B, C_in, T, F), jnp.float32)

    out = conv_film_block(x, params, kernel_size=K, dilation=d, pool_size=p,
                          use_film=True, n_f=n_f)
    out = jax.block_until_ready(out)

    ref = reference(x, params, kernel_size=K, dilation=d, pool_size=p,
                    use_film=True, n_f=n_f)
    assert out.shape == (B, C_out, T // p, F // p)
    np.testing.assert_allclose(np.asarray(out), np.asarray(ref),
                               atol=2e-3, rtol=2e-3)
    print("KERNEL_OK")
</pallas_src>

<mosaic_0001>
module attributes {stable_mosaic.version = 11 : i64} {
  func.func @kernel(%arg0: i32, %arg1: memref<8x512xf32, #tpu.memory_space<vmem>>, %arg2: memref<8x72xf32, #tpu.memory_space<vmem>>, %arg3: memref<8x1xf32, #tpu.memory_space<vmem>>, %arg4: memref<8x16xf32, #tpu.memory_space<vmem>>, %arg5: memref<8x16xf32, #tpu.memory_space<vmem>>, %arg6: memref<512x128xf32, #tpu.memory_space<vmem>>, %arg7: memref<8x128xf32, #tpu.memory_space<vmem>>) attributes {dimension_semantics = [#tpu.dimension_semantics<arbitrary>], iteration_bounds = array<i64: 1>, scalar_prefetch = 0 : i64, scratch_operands = 0 : i64, tpu.core_type = #tpu.core_type<tc>, window_params = [{pipeline_mode = #tpu.pipeline_mode<synchronous>, transform_indices = @transform_0, window_bounds = array<i64: 8, 512>}, {pipeline_mode = #tpu.pipeline_mode<synchronous>, transform_indices = @transform_1, window_bounds = array<i64: 8, 72>}, {pipeline_mode = #tpu.pipeline_mode<synchronous>, transform_indices = @transform_2, window_bounds = array<i64: 8, 1>}, {pipeline_mode = #tpu.pipeline_mode<synchronous>, transform_indices = @transform_3, window_bounds = array<i64: 8, 16>}, {pipeline_mode = #tpu.pipeline_mode<synchronous>, transform_indices = @transform_4, window_bounds = array<i64: 8, 16>}, {pipeline_mode = #tpu.pipeline_mode<synchronous>, transform_indices = @transform_5, window_bounds = array<i64: 512, 128>}, {pipeline_mode = #tpu.pipeline_mode<synchronous>, transform_indices = @transform_6, window_bounds = array<i64: 8, 128>}]} {
    %0 = tpu.iota {dimensions = array<i32: 1>} : vector<1x512xi32>
    %c15_i32 = arith.constant 15 : i32
    %1 = vector.broadcast %c15_i32 : i32 to vector<1x512xi32>
    %2 = arith.andi %0, %1 : vector<1x512xi32>
    %c4_i32 = arith.constant 4 : i32
    %3 = vector.broadcast %c4_i32 : i32 to vector<1x512xi32>
    %4 = arith.shrsi %0, %3 : vector<1x512xi32>
    %c15_i32_0 = arith.constant 15 : i32
    %5 = vector.broadcast %c15_i32_0 : i32 to vector<1x512xi32>
    %6 = arith.andi %4, %5 : vector<1x512xi32>
    %c0 = arith.constant 0 : index
    %c0_1 = arith.constant 0 : index
    %7 = vector.load %arg1[%c0, %c0_1] : memref<8x512xf32, #tpu.memory_space<vmem>>, vector<8x512xf32>
    %c0_2 = arith.constant 0 : index
    %c0_3 = arith.constant 0 : index
    %8 = vector.load %arg3[%c0_2, %c0_3] : memref<8x1xf32, #tpu.memory_space<vmem>>, vector<8x1xf32>
    %9 = vector.shape_cast %8 : vector<8x1xf32> to vector<8x1xf32>
    %10 = vector.broadcast %9 : vector<8x1xf32> to vector<8x512xf32>
    %c17_i32 = arith.constant 17 : i32
    %11 = tpu.dynamic_rotate %7 by %c17_i32 dim 1 : vector<8x512xf32>, i32 -> vector<8x512xf32>
    %c1_i32 = arith.constant 1 : i32
    %12 = vector.broadcast %c1_i32 : i32 to vector<1x512xi32>
    %13 = arith.cmpi sge, %6, %12 : vector<1x512xi32>
    %c1_i32_4 = arith.constant 1 : i32
    %14 = vector.broadcast %c1_i32_4 : i32 to vector<1x512xi32>
    %15 = arith.cmpi sge, %2, %14 : vector<1x512xi32>
    %16 = arith.andi %13, %15 : vector<1x512xi1>
    %cst = arith.constant 0.000000e+00 : f32
    %17 = vector.shape_cast %16 : vector<1x512xi1> to vector<1x512xi1>
    %18 = vector.broadcast %17 : vector<1x512xi1> to vector<8x512xi1>
    %19 = vector.broadcast %cst : f32 to vector<8x512xf32>
    %20 = arith.select %18, %11, %19 : vector<8x512xi1>, vector<8x512xf32>
    %c0_5 = arith.constant 0 : index
    %c0_6 = arith.constant 0 : index
    %21 = vector.load %arg2[%c0_5, %c0_6] : memref<8x72xf32, #tpu.memory_space<vmem>>, vector<8x8xf32>
    %cst_7 = arith.constant dense<0.000000e+00> : vector<8x512xf32>
    %22 = tpu.matmul %21, %20, %cst_7 {dimension_numbers = #tpu.dot_dimension_numbers<[1], [0], [0], [1], [0, 0, 1, 1], [], []>} : vector<8x8xf32>, vector<8x512xf32>, vector<8x512xf32> -> vector<8x512xf32>
    %23 = arith.addf %10, %22 : vector<8x512xf32>
    %c16_i32 = arith.constant 16 : i32
    %24 = tpu.dynamic_rotate %7 by %c16_i32 dim 1 : vector<8x512xf32>, i32 -> vector<8x512xf32>
    %c1_i32_8 = arith.constant 1 : i32
    %25 = vector.broadcast %c1_i32_8 : i32 to vector<1x512xi32>
    %26 = arith.cmpi sge, %6, %25 : vector<1x512xi32>
    %cst_9 = arith.constant 0.000000e+00 : f32
    %27 = vector.shape_cast %26 : vector<1x512xi1> to vector<1x512xi1>
    %28 = vector.broadcast %27 : vector<1x512xi1> to vector<8x512xi1>
    %29 = vector.broadcast %cst_9 : f32 to vector<8x512xf32>
    %30 = arith.select %28, %24, %29 : vector<8x512xi1>, vector<8x512xf32>
    %c0_10 = arith.constant 0 : index
    %c8 = arith.constant 8 : index
    %31 = vector.load %arg2[%c0_10, %c8] : memref<8x72xf32, #tpu.memory_space<vmem>>, vector<8x8xf32>
    %cst_11 = arith.constant dense<0.000000e+00> : vector<8x512xf32>
    %32 = tpu.matmul %31, %30, %cst_11 {dimension_numbers = #tpu.dot_dimension_numbers<[1], [0], [0], [1], [0, 0, 1, 1], [], []>} : vector<8x8xf32>, vector<8x512xf32>, vector<8x512xf32> -> vector<8x512xf32>
    %33 = arith.addf %23, %32 : vector<8x512xf32>
    %c15_i32_12 = arith.constant 15 : i32
    %34 = tpu.dynamic_rotate %7 by %c15_i32_12 dim 1 : vector<8x512xf32>, i32 -> vector<8x512xf32>
    %c1_i32_13 = arith.constant 1 : i32
    %35 = vector.broadcast %c1_i32_13 : i32 to vector<1x512xi32>
    %36 = arith.cmpi sge, %6, %35 : vector<1x512xi32>
    %c15_i32_14 = arith.constant 15 : i32
    %37 = vector.broadcast %c15_i32_14 : i32 to vector<1x512xi32>
    %38 = arith.cmpi slt, %2, %37 : vector<1x512xi32>
    %39 = arith.andi %36, %38 : vector<1x512xi1>
    %cst_15 = arith.constant 0.000000e+00 : f32
    %40 = vector.shape_cast %39 : vector<1x512xi1> to vector<1x512xi1>
    %41 = vector.broadcast %40 : vector<1x512xi1> to vector<8x512xi1>
    %42 = vector.broadcast %cst_15 : f32 to vector<8x512xf32>
    %43 = arith.select %41, %34, %42 : vector<8x512xi1>, vector<8x512xf32>
    %c0_16 = arith.constant 0 : index
    %c16 = arith.constant 16 : index
    %44 = vector.load %arg2[%c0_16, %c16] : memref<8x72xf32, #tpu.memory_space<vmem>>, vector<8x8xf32>
    %cst_17 = arith.constant dense<0.000000e+00> : vector<8x512xf32>
    %45 = tpu.matmul %44, %43, %cst_17 {dimension_numbers = #tpu.dot_dimension_numbers<[1], [0], [0], [1], [0, 0, 1, 1], [], []>} : vector<8x8xf32>, vector<8x512xf32>, vector<8x512xf32> -> vector<8x512xf32>
    %46 = arith.addf %33, %45 : vector<8x512xf32>
    %c1_i32_18 = arith.constant 1 : i32
    %47 = tpu.dynamic_rotate %7 by %c1_i32_18 dim 1 : vector<8x512xf32>, i32 -> vector<8x512xf32>
    %c1_i32_19 = arith.constant 1 : i32
    %48 = vector.broadcast %c1_i32_19 : i32 to vector<1x512xi32>
    %49 = arith.cmpi sge, %2, %48 : vector<1x512xi32>
    %cst_20 = arith.constant 0.000000e+00 : f32
    %50 = vector.shape_cast %49 : vector<1x512xi1> to vector<1x512xi1>
    %51 = vector.broadcast %50 : vector<1x512xi1> to vector<8x512xi1>
    %52 = vector.broadcast %cst_20 : f32 to vector<8x512xf32>
    %53 = arith.select %51, %47, %52 : vector<8x512xi1>, vector<8x512xf32>
    %c0_21 = arith.constant 0 : index
    %c24 = arith.constant 24 : index
    %54 = vector.load %arg2[%c0_21, %c24] : memref<8x72xf32, #tpu.memory_space<vmem>>, vector<8x8xf32>
    %cst_22 = arith.constant dense<0.000000e+00> : vector<8x512xf32>
    %55 = tpu.matmul %54, %53, %cst_22 {dimension_numbers = #tpu.dot_dimension_numbers<[1], [0], [0], [1], [0, 0, 1, 1], [], []>} : vector<8x8xf32>, vector<8x512xf32>, vector<8x512xf32> -> vector<8x512xf32>
    %56 = arith.addf %46, %55 : vector<8x512xf32>
    %c0_23 = arith.constant 0 : index
    %c32 = arith.constant 32 : index
    %57 = vector.load %arg2[%c0_23, %c32] : memref<8x72xf32, #tpu.memory_space<vmem>>, vector<8x8xf32>
    %cst_24 = arith.constant dense<0.000000e+00> : vector<8x512xf32>
    %58 = tpu.matmul %57, %7, %cst_24 {dimension_numbers = #tpu.dot_dimension_numbers<[1], [0], [0], [1], [0, 0, 1, 1], [], []>} : vector<8x8xf32>, vector<8x512xf32>, vector<8x512xf32> -> vector<8x512xf32>
    %59 = arith.addf %56, %58 : vector<8x512xf32>
    %c511_i32 = arith.constant 511 : i32
    %60 = tpu.dynamic_rotate %7 by %c511_i32 dim 1 : vector<8x512xf32>, i32 -> vector<8x512xf32>
    %c15_i32_25 = arith.constant 15 : i32
    %61 = vector.broadcast %c15_i32_25 : i32 to vector<1x512xi32>
    %62 = arith.cmpi slt, %2, %61 : vector<1x512xi32>
    %cst_26 = arith.constant 0.000000e+00 : f32
    %63 = vector.shape_cast %62 : vector<1x512xi1> to vector<1x512xi1>
    %64 = vector.broadcast %63 : vector<1x512xi1> to vector<8x512xi1>
    %65 = vector.broadcast %cst_26 : f32 to vector<8x512xf32>
    %66 = arith.select %64, %60, %65 : vector<8x512xi1>, vector<8x512xf32>
    %c0_27 = arith.constant 0 : index
    %c40 = arith.constant 40 : index
    %67 = vector.load %arg2[%c0_27, %c40] : memref<8x72xf32, #tpu.memory_space<vmem>>, vector<8x8xf32>
    %cst_28 = arith.constant dense<0.000000e+00> : vector<8x512xf32>
    %68 = tpu.matmul %67, %66, %cst_28 {dimension_numbers = #tpu.dot_dimension_numbers<[1], [0], [0], [1], [0, 0, 1, 1], [], []>} : vector<8x8xf32>, vector<8x512xf32>, vector<8x512xf32> -> vector<8x512xf32>
    %69 = arith.addf %59, %68 : vector<8x512xf32>
    %c497_i32 = arith.constant 497 : i32
    %70 = tpu.dynamic_rotate %7 by %c497_i32 dim 1 : vector<8x512xf32>, i32 -> vector<8x512xf32>
    %c15_i32_29 = arith.constant 15 : i32
    %71 = vector.broadcast %c15_i32_29 : i32 to vector<1x512xi32>
    %72 = arith.cmpi slt, %6, %71 : vector<1x512xi32>
    %c1_i32_30 = arith.constant 1 : i32
    %73 = vector.broadcast %c1_i32_30 : i32 to vector<1x512xi32>
    %74 = arith.cmpi sge, %2, %73 : vector<1x512xi32>
    %75 = arith.andi %72, %74 : vector<1x512xi1>
    %cst_31 = arith.constant 0.000000e+00 : f32
    %76 = vector.shape_cast %75 : vector<1x512xi1> to vector<1x512xi1>
    %77 = vector.broadcast %76 : vector<1x512xi1> to vector<8x512xi1>
    %78 = vector.broadcast %cst_31 : f32 to vector<8x512xf32>
    %79 = arith.select %77, %70, %78 : vector<8x512xi1>, vector<8x512xf32>
    %c0_32 = arith.constant 0 : index
    %c48 = arith.constant 48 : index
    %80 = vector.load %arg2[%c0_32, %c48] : memref<8x72xf32, #tpu.memory_space<vmem>>, vector<8x8xf32>
    %cst_33 = arith.constant dense<0.000000e+00> : vector<8x512xf32>
    %81 = tpu.matmul %80, %79, %cst_33 {dimension_numbers = #tpu.dot_dimension_numbers<[1], [0], [0], [1], [0, 0, 1, 1], [], []>} : vector<8x8xf32>, vector<8x512xf32>, vector<8x512xf32> -> vector<8x512xf32>
    %82 = arith.addf %69, %81 : vector<8x512xf32>
    %c496_i32 = arith.constant 496 : i32
    %83 = tpu.dynamic_rotate %7 by %c496_i32 dim 1 : vector<8x512xf32>, i32 -> vector<8x512xf32>
    %c15_i32_34 = arith.constant 15 : i32
    %84 = vector.broadcast %c15_i32_34 : i32 to vector<1x512xi32>
    %85 = arith.cmpi slt, %6, %84 : vector<1x512xi32>
    %cst_35 = arith.constant 0.000000e+00 : f32
    %86 = vector.shape_cast %85 : vector<1x512xi1> to vector<1x512xi1>
    %87 = vector.broadcast %86 : vector<1x512xi1> to vector<8x512xi1>
    %88 = vector.broadcast %cst_35 : f32 to vector<8x512xf32>
    %89 = arith.select %87, %83, %88 : vector<8x512xi1>, vector<8x512xf32>
    %c0_36 = arith.constant 0 : index
    %c56 = arith.constant 56 : index
    %90 = vector.load %arg2[%c0_36, %c56] : memref<8x72xf32, #tpu.memory_space<vmem>>, vector<8x8xf32>
    %cst_37 = arith.constant dense<0.000000e+00> : vector<8x512xf32>
    %91 = tpu.matmul %90, %89, %cst_37 {dimension_numbers = #tpu.dot_dimension_numbers<[1], [0], [0], [1], [0, 0, 1, 1], [], []>} : vector<8x8xf32>, vector<8x512xf32>, vector<8x512xf32> -> vector<8x512xf32>
    %92 = arith.addf %82, %91 : vector<8x512xf32>
    %c495_i32 = arith.constant 495 : i32
    %93 = tpu.dynamic_rotate %7 by %c495_i32 dim 1 : vector<8x512xf32>, i32 -> vector<8x512xf32>
    %c15_i32_38 = arith.constant 15 : i32
    %94 = vector.broadcast %c15_i32_38 : i32 to vector<1x512xi32>
    %95 = arith.cmpi slt, %6, %94 : vector<1x512xi32>
    %c15_i32_39 = arith.constant 15 : i32
    %96 = vector.broadcast %c15_i32_39 : i32 to vector<1x512xi32>
    %97 = arith.cmpi slt, %2, %96 : vector<1x512xi32>
    %98 = arith.andi %95, %97 : vector<1x512xi1>
    %cst_40 = arith.constant 0.000000e+00 : f32
    %99 = vector.shape_cast %98 : vector<1x512xi1> to vector<1x512xi1>
    %100 = vector.broadcast %99 : vector<1x512xi1> to vector<8x512xi1>
    %101 = vector.broadcast %cst_40 : f32 to vector<8x512xf32>
    %102 = arith.select %100, %93, %101 : vector<8x512xi1>, vector<8x512xf32>
    %c0_41 = arith.constant 0 : index
    %c64 = arith.constant 64 : index
    %103 = vector.load %arg2[%c0_41, %c64] : memref<8x72xf32, #tpu.memory_space<vmem>>, vector<8x8xf32>
    %cst_42 = arith.constant dense<0.000000e+00> : vector<8x512xf32>
    %104 = tpu.matmul %103, %102, %cst_42 {dimension_numbers = #tpu.dot_dimension_numbers<[1], [0], [0], [1], [0, 0, 1, 1], [], []>} : vector<8x8xf32>, vector<8x512xf32>, vector<8x512xf32> -> vector<8x512xf32>
    %105 = arith.addf %92, %104 : vector<8x512xf32>
    %cst_43 = arith.constant 0.000000e+00 : f32
    %106 = vector.broadcast %cst_43 : f32 to vector<8x512xf32>
    %107 = arith.maximumf %105, %106 : vector<8x512xf32>
    %108 = tpu.iota {dimensions = array<i32: 0>} : vector<16x512xi32>
    %109 = vector.broadcast %2 : vector<1x512xi32> to vector<16x512xi32>
    %110 = arith.cmpi eq, %108, %109 : vector<16x512xi32>
    %111 = arith.extui %110 : vector<16x512xi1> to vector<16x512xi32>
    %112 = arith.sitofp %111 : vector<16x512xi32> to vector<16x512xf32>
    %c0_44 = arith.constant 0 : index
    %c0_45 = arith.constant 0 : index
    %113 = vector.load %arg4[%c0_44, %c0_45] : memref<8x16xf32, #tpu.memory_space<vmem>>, vector<8x16xf32>
    %cst_46 = arith.constant dense<0.000000e+00> : vector<8x512xf32>
    %114 = tpu.matmul %113, %112, %cst_46 {dimension_numbers = #tpu.dot_dimension_numbers<[1], [0], [0], [1], [0, 0, 1, 1], [], []>} : vector<8x16xf32>, vector<16x512xf32>, vector<8x512xf32> -> vector<8x512xf32>
    %c0_47 = arith.constant 0 : index
    %c0_48 = arith.constant 0 : index
    %115 = vector.load %arg5[%c0_47, %c0_48] : memref<8x16xf32, #tpu.memory_space<vmem>>, vector<8x16xf32>
    %cst_49 = arith.constant dense<0.000000e+00> : vector<8x512xf32>
    %116 = tpu.matmul %115, %112, %cst_49 {dimension_numbers = #tpu.dot_dimension_numbers<[1], [0], [0], [1], [0, 0, 1, 1], [], []>} : vector<8x16xf32>, vector<16x512xf32>, vector<8x512xf32> -> vector<8x512xf32>
    %117 = arith.mulf %107, %114 : vector<8x512xf32>
    %118 = arith.addf %117, %116 : vector<8x512xf32>
    %c511_i32_50 = arith.constant 511 : i32
    %119 = tpu.dynamic_rotate %118 by %c511_i32_50 dim 1 : vector<8x512xf32>, i32 -> vector<8x512xf32>
    %120 = arith.maximumf %118, %119 : vector<8x512xf32>
    %c496_i32_51 = arith.constant 496 : i32
    %121 = tpu.dynamic_rotate %120 by %c496_i32_51 dim 1 : vector<8x512xf32>, i32 -> vector<8x512xf32>
    %122 = arith.maximumf %120, %121 : vector<8x512xf32>
    %c0_52 = arith.constant 0 : index
    %c0_53 = arith.constant 0 : index
    %123 = vector.load %arg6[%c0_52, %c0_53] : memref<512x128xf32, #tpu.memory_space<vmem>>, vector<512x128xf32>
    %cst_54 = arith.constant dense<0.000000e+00> : vector<8x128xf32>
    %124 = tpu.matmul %122, %123, %cst_54 {dimension_numbers = #tpu.dot_dimension_numbers<[1], [0], [0], [1], [0, 0, 1, 1], [], []>} : vector<8x512xf32>, vector<512x128xf32>, vector<8x128xf32> -> vector<8x128xf32>
    %125 = tpu.iota {dimensions = array<i32: 1>} : vector<1x128xi32>
    %c0_i32 = arith.constant 0 : i32
    %126 = vector.broadcast %c0_i32 : i32 to vector<1x128xi32>
    %127 = arith.cmpi sge, %125, %126 : vector<1x128xi32>
    %c64_i32 = arith.constant 64 : i32
    %128 = vector.broadcast %c64_i32 : i32 to vector<1x128xi32>
    %129 = arith.cmpi slt, %125, %128 : vector<1x128xi32>
    %130 = arith.andi %127, %129 : vector<1x128xi1>
    %c64_i32_55 = arith.constant 64 : i32
    %131 = vector.broadcast %c64_i32_55 : i32 to vector<1x128xi32>
    %132 = arith.cmpi sge, %125, %131 : vector<1x128xi32>
    %c128_i32 = arith.constant 128 : i32
    %133 = vector.broadcast %c128_i32 : i32 to vector<1x128xi32>
    %134 = arith.cmpi slt, %125, %133 : vector<1x128xi32>
    %135 = arith.andi %132, %134 : vector<1x128xi1>
    %cst_56 = arith.constant 0.000000e+00 : f32
    %136 = vector.broadcast %cst_56 : f32 to vector<8x128xf32>
    %cst_57 = arith.constant 0.000000e+00 : f32
    %137 = vector.shape_cast %130 : vector<1x128xi1> to vector<1x128xi1>
    %138 = vector.broadcast %137 : vector<1x128xi1> to vector<8x128xi1>
    %139 = vector.broadcast %cst_57 : f32 to vector<8x128xf32>
    %140 = arith.select %138, %124, %139 : vector<8x128xi1>, vector<8x128xf32>
    %cst_58 = arith.constant dense<0.000000e+00> : vector<8xf32>
    %141 = vector.multi_reduction <add>, %140, %cst_58 [1] : vector<8x128xf32> to vector<8xf32>
    %142 = vector.shape_cast %141 : vector<8xf32> to vector<8x1xf32>
    %cst_59 = arith.constant 1.562500e-02 : f32
    %143 = vector.broadcast %cst_59 : f32 to vector<8x1xf32>
    %144 = arith.mulf %142, %143 : vector<8x1xf32>
    %145 = vector.shape_cast %130 : vector<1x128xi1> to vector<1x128xi1>
    %146 = vector.broadcast %145 : vector<1x128xi1> to vector<8x128xi1>
    %147 = vector.shape_cast %144 : vector<8x1xf32> to vector<8x1xf32>
    %148 = vector.broadcast %147 : vector<8x1xf32> to vector<8x128xf32>
    %149 = arith.select %146, %148, %136 : vector<8x128xi1>, vector<8x128xf32>
    %cst_60 = arith.constant 0.000000e+00 : f32
    %150 = vector.shape_cast %135 : vector<1x128xi1> to vector<1x128xi1>
    %151 = vector.broadcast %150 : vector<1x128xi1> to vector<8x128xi1>
    %152 = vector.broadcast %cst_60 : f32 to vector<8x128xf32>
    %153 = arith.select %151, %124, %152 : vector<8x128xi1>, vector<8x128xf32>
    %cst_61 = arith.constant dense<0.000000e+00> : vector<8xf32>
    %154 = vector.multi_reduction <add>, %153, %cst_61 [1] : vector<8x128xf32> to vector<8xf32>
    %155 = vector.shape_cast %154 : vector<8xf32> to vector<8x1xf32>
    %cst_62 = arith.constant 1.562500e-02 : f32
    %156 = vector.broadcast %cst_62 : f32 to vector<8x1xf32>
    %157 = arith.mulf %155, %156 : vector<8x1xf32>
    %158 = vector.shape_cast %135 : vector<1x128xi1> to vector<1x128xi1>
    %159 = vector.broadcast %158 : vector<1x128xi1> to vector<8x128xi1>
    %160 = vector.shape_cast %157 : vector<8x1xf32> to vector<8x1xf32>
    %161 = vector.broadcast %160 : vector<8x1xf32> to vector<8x128xf32>
    %162 = arith.select %159, %161, %149 : vector<8x128xi1>, vector<8x128xf32>
    %163 = arith.subf %124, %162 : vector<8x128xf32>
    %cst_63 = arith.constant 0.000000e+00 : f32
    %164 = vector.broadcast %cst_63 : f32 to vector<8x128xf32>
    %165 = arith.mulf %163, %163 : vector<8x128xf32>
    %cst_64 = arith.constant 0.000000e+00 : f32
    %166 = vector.shape_cast %130 : vector<1x128xi1> to vector<1x128xi1>
    %167 = vector.broadcast %166 : vector<1x128xi1> to vector<8x128xi1>
    %168 = vector.broadcast %cst_64 : f32 to vector<8x128xf32>
    %169 = arith.select %167, %165, %168 : vector<8x128xi1>, vector<8x128xf32>
    %cst_65 = arith.constant dense<0.000000e+00> : vector<8xf32>
    %170 = vector.multi_reduction <add>, %169, %cst_65 [1] : vector<8x128xf32> to vector<8xf32>
    %171 = vector.shape_cast %170 : vector<8xf32> to vector<8x1xf32>
    %cst_66 = arith.constant 1.562500e-02 : f32
    %172 = vector.broadcast %cst_66 : f32 to vector<8x1xf32>
    %173 = arith.mulf %171, %172 : vector<8x1xf32>
    %174 = vector.shape_cast %130 : vector<1x128xi1> to vector<1x128xi1>
    %175 = vector.broadcast %174 : vector<1x128xi1> to vector<8x128xi1>
    %176 = vector.shape_cast %173 : vector<8x1xf32> to vector<8x1xf32>
    %177 = vector.broadcast %176 : vector<8x1xf32> to vector<8x128xf32>
    %178 = arith.select %175, %177, %164 : vector<8x128xi1>, vector<8x128xf32>
    %179 = arith.mulf %163, %163 : vector<8x128xf32>
    %cst_67 = arith.constant 0.000000e+00 : f32
    %180 = vector.shape_cast %135 : vector<1x128xi1> to vector<1x128xi1>
    %181 = vector.broadcast %180 : vector<1x128xi1> to vector<8x128xi1>
    %182 = vector.broadcast %cst_67 : f32 to vector<8x128xf32>
    %183 = arith.select %181, %179, %182 : vector<8x128xi1>, vector<8x128xf32>
    %cst_68 = arith.constant dense<0.000000e+00> : vector<8xf32>
    %184 = vector.multi_reduction <add>, %183, %cst_68 [1] : vector<8x128xf32> to vector<8xf32>
    %185 = vector.shape_cast %184 : vector<8xf32> to vector<8x1xf32>
    %cst_69 = arith.constant 1.562500e-02 : f32
    %186 = vector.broadcast %cst_69 : f32 to vector<8x1xf32>
    %187 = arith.mulf %185, %186 : vector<8x1xf32>
    %188 = vector.shape_cast %135 : vector<1x128xi1> to vector<1x128xi1>
    %189 = vector.broadcast %188 : vector<1x128xi1> to vector<8x128xi1>
    %190 = vector.shape_cast %187 : vector<8x1xf32> to vector<8x1xf32>
    %191 = vector.broadcast %190 : vector<8x1xf32> to vector<8x128xf32>
    %192 = arith.select %189, %191, %178 : vector<8x128xi1>, vector<8x128xf32>
    %cst_70 = arith.constant 9.99999974E-6 : f32
    %193 = vector.broadcast %cst_70 : f32 to vector<8x128xf32>
    %194 = arith.addf %192, %193 : vector<8x128xf32>
    %195 = math.rsqrt %194 : vector<8x128xf32>
    %196 = arith.mulf %163, %195 : vector<8x128xf32>
    %c0_71 = arith.constant 0 : index
    %c0_72 = arith.constant 0 : index
    %197 = vector.load %arg7[%c0_71, %c0_72] : memref<8x128xf32, #tpu.memory_space<vmem>>, vector<8x128xf32>
    tpu.vector_store %arg7[%c0_71, %c0_72], %196 {strides = array<i32>} : memref<8x128xf32, #tpu.memory_space<vmem>>, vector<8x128xf32>,
    return
  }
  func.func @transform_0(%arg0: i32) -> (i32, i32) {
    %c0_i32 = arith.constant 0 : i32
    %c0_i32_0 = arith.constant 0 : i32
    %c0_i32_1 = arith.constant 0 : i32
    return %c0_i32, %c0_i32_0 : i32, i32
  }
  func.func @transform_1(%arg0: i32) -> (i32, i32) {
    %c0_i32 = arith.constant 0 : i32
    %c0_i32_0 = arith.constant 0 : i32
    %c0_i32_1 = arith.constant 0 : i32
    return %c0_i32, %c0_i32_0 : i32, i32
  }
  func.func @transform_2(%arg0: i32) -> (i32, i32) {
    %c0_i32 = arith.constant 0 : i32
    %c0_i32_0 = arith.constant 0 : i32
    %c0_i32_1 = arith.constant 0 : i32
    return %c0_i32, %c0_i32_0 : i32, i32
  }
  func.func @transform_3(%arg0: i32) -> (i32, i32) {
    %c0_i32 = arith.constant 0 : i32
    %c0_i32_0 = arith.constant 0 : i32
    %c0_i32_1 = arith.constant 0 : i32
    return %c0_i32, %c0_i32_0 : i32, i32
  }
  func.func @transform_4(%arg0: i32) -> (i32, i32) {
    %c0_i32 = arith.constant 0 : i32
    %c0_i32_0 = arith.constant 0 : i32
    %c0_i32_1 = arith.constant 0 : i32
    return %c0_i32, %c0_i32_0 : i32, i32
  }
  func.func @transform_5(%arg0: i32) -> (i32, i32) {
    %c0_i32 = arith.constant 0 : i32
    %c0_i32_0 = arith.constant 0 : i32
    %c0_i32_1 = arith.constant 0 : i32
    return %c0_i32, %c0_i32_0 : i32, i32
  }
  func.func @transform_6(%arg0: i32) -> (i32, i32) {
    %c0_i32 = arith.constant 0 : i32
    %c0_i32_0 = arith.constant 0 : i32
    %c0_i32_1 = arith.constant 0 : i32
    return %c0_i32, %c0_i32_0 : i32, i32
  }
}

</mosaic_0001>

<bundles_post_ra>
// kernel: tpu_custom_call.1
= control target key start
LH: loop header
LB: loop body
LE: loop exit
PB: predicated region body
PF: predicated region fallthrough
CT: control target
= control target key end

     0   :  { %11 = vsyncpa [#allocation3], 0  ;;  %s2323_s0 = inlined_call_operand.hbm [shape: f32[8,512], index: 0, kind: input, shape index: {}]   ;;  %s2324_s1 = inlined_call_operand.vmem [shape: f32[8,72], index: 1, kind: input, shape index: {}]   ;;  %s2325_s2 = inlined_call_operand.vmem [shape: f32[8,1], index: 2, kind: input, shape index: {}]   ;;  %s2326_s3 = inlined_call_operand.hbm [shape: f32[8,16], index: 3, kind: input, shape index: {}]   ;;  %s2327_s4 = inlined_call_operand.hbm [shape: f32[8,16], index: 4, kind: input, shape index: {}]   ;;  %s2328_s5 = inlined_call_operand.hbm [shape: f32[512,128], index: 5, kind: input, shape index: {}]   ;;  %s2329_s6 = inlined_call_operand.hbm [shape: f32[8,128], index: 6, kind: output, shape index: {}]  }
   0x1   :  { %12 = vsyncpa [#allocation6], 0 }
   0x2   :  { %13 = vsyncpa [#allocation9], 0  ;;  %s35_s23 = sshll.u32 %s2326_s3, 4  ;;  %s36_s23 = int_to_ptr.hbm [resolvable:$true] %s35_s23 }
   0x3   :  { %14 = vsyncpa [#allocation4], 0  ;;  %s1857_s24 = smov [#allocation5]   ;;  %s20_s28 = sshll.u32 %s2323_s0, 4  ;;  %s21_s28 = int_to_ptr.hbm [resolvable:$true] %s20_s28 }
   0x4   :  { %s37_s25 = sshll.u32 %s1857_s24, 4  ;;  %s1858_s29 = smov [#allocation2]   ;;  %s38_s25 = int_to_ptr.vmem [resolvable:$true] %s37_s25 }
   0x5   :  { %40 = dma.hbm_to_vmem [thread:$0]  %s36_s23, 128, %s38_s25, [#allocation6]  }
   0x6   :  { %s22_s30 = sshll.u32 %s1858_s29, 4  ;;  %s46_s9 = sshll.u32 %s2327_s4, 4  ;;  %s23_s30 = int_to_ptr.vmem [resolvable:$true] %s22_s30  ;;  %s47_s9 = int_to_ptr.hbm [resolvable:$true] %s46_s9 }
   0x7   :  { %25 = dma.hbm_to_vmem [thread:$0]  %s21_s28, 512, %s23_s30, [#allocation3]  }
   0x8   :  { %s56_s11 = sshll.u32 %s2328_s5, 4  ;;  %s1859_s12 = smov [#allocation7]   ;;  %s57_s11 = int_to_ptr.hbm [resolvable:$true] %s56_s11 }
   0x9   :  { %s48_s13 = sshll.u32 %s1859_s12, 4  ;;  %s1860_s0 = smov [#allocation8]   ;;  %s49_s13 = int_to_ptr.vmem [resolvable:$true] %s48_s13 }
   0xa   :  { %51 = dma.hbm_to_vmem [thread:$0]  %s47_s9, 128, %s49_s13, [#allocation6]  }
   0xb   :  { %s58_s14 = sshll.u32 %s1860_s0, 4  ;;  %s1861_s15 = smov 128   ;;  %s59_s14 = int_to_ptr.vmem [resolvable:$true] %s58_s14 }
   0xc   :  { %s1862_s16 = smov 8  }
   0xd   :  { %64 = dma.hbm_to_vmem [thread:$0]  %s57_s11, 8192, %s59_s14, [#allocation9], %s1861_s15, %s1861_s15, %s1862_s16  }
   0xe   :  { %1849 = dma.done.wait [#allocation3], 512  }
   0xf   :  { %1850 = vsyncadd [#allocation3], 4294966784 }
  0x10   :  { %1851 = dma.done.wait [#allocation6], 256  }
  0x11   :  { %1852 = vsyncadd [#allocation6], 4294967040 }
  0x12   :  { %1853 = dma.done.wait [#allocation9], 8192  }
  0x13   :  { %1854 = vsyncadd [#allocation9], 4294959104  ;;  %v1928_v0 = vld [vmem:[#allocation2 + $0x18] sm:$0xff]  ;;  %v1930_v1 = vld [vmem:[#allocation2 + $0x8] sm:$0xff]  ;;  %s1863_s4 = smov 17   ;;  %s1864_s5 = smov 16   ;;  %v81_v5 = vlaneseq }
  0x14   :  { %114 = vrot.lane.b32.xlu1 %v1928_v0, %s1863_s4  ;;  %110 = vrot.lane.b32.xlu0 %v1930_v1, %s1863_s4  ;;  %v1935_v2 = vld [vmem:[#allocation2 + $0x10] sm:$0xff]  ;;  %v1937_v3 = vld [vmem:[#allocation2] sm:$0xff]  ;;  %s1865_s19 = smov 120   ;;  %s1866_s20 = smov 15   ;;  %v1878_v22 = vmov 0  }
  0x15   :  { %236 = vrot.lane.b32.xlu2 %v1930_v1, %s1864_s5  ;;  %v1945_v4 = vld [vmem:[%s2324_s1] sm:$0xff]  ;;  %s1867_s21 = smov 112   ;;  %s1868_s1 = smov 1   ;;  %v1983_v6 = vand.u32 127, %v81_v5  ;;  %1705 = vset.pattern.permute.xlu1 %v1878_v22 }
  0x16   :  { %s1869_s22 = smov 104   ;;  %s1870_s23 = smov 96   ;;  %v102_v21 = vld [vmem:[%s2325_s2] sm:$0xff]  ;;  %1726 = vset.pattern.permute.xlu0 %v1878_v22 }
  0x17   :  { %s1871_s24 = smov 127   ;;  %s1872_s25 = smov 88   ;;  %v84_v7 = vadd.s32 256, %v1983_v6  ;;  %v85_v8 = vadd.s32 384, %v1983_v6  ;;  %v83_v20 = vadd.s32 128, %v1983_v6  ;;  %v90_v23 = vshra.s32 %v1983_v6, 4 }
  0x18   :  { %s1873_s26 = smov 113   ;;  %s1874_s27 = smov 80   ;;  %v2029_v27 = vand.u32 15, %v1983_v6  ;;  %vm116_vm13 = vcmp.lt.s32.totalorder %v1983_v6, 17 }
  0x19   :  { %v92_v9 = vshra.s32 %v84_v7, 4  ;;  %v93_v10 = vshra.s32 %v85_v8, 4  ;;  %s1875_s28 = smov 72   ;;  %s1876_s29 = smov 111   ;;  %v1991_v11 = vand.u32 15, %v84_v7  ;;  %v1995_v14 = vand.u32 15, %v85_v8 }
  0x1a   :  { %s1877_s30 = smov 64   ;;  %v91_v24 = vshra.s32 %v83_v20, 4  ;;  %v2031_v28 = vand.u32 15, %v90_v23  ;;  %v2033_v29 = vand.u32 15, %v83_v20  ;;  %vm125_vm9 = vcmp.ge.s32.totalorder %v2029_v27, 1  ;;  %s1880_s2 = smov [#allocation10]  }
  0x1b   :  { %v1993_v12 = vand.u32 15, %v92_v9  ;;  %v1997_v15 = vand.u32 15, %v93_v10  ;;  %vm127_vm1 = vcmp.ge.s32.totalorder %v1991_v11, 1  ;;  %vm2332_vm4 = vcmp.ge.s32.totalorder %v1995_v14, 1  ;;  %s1567_s9 = sshll.u32 %s1880_s2, 4  ;;  %s1569_s11 = sshll.u32 %s2329_s6, 4  ;;  %s1568_s9 = int_to_ptr.vmem [resolvable:$true] %s1567_s9  ;;  %s1570_s11 = int_to_ptr.hbm [resolvable:$true] %s1569_s11 }
  0x1c   :  { %112 = vrot.lane.b32.xlu0 %v1935_v2, %s1863_s4  ;;  %108 = vrot.lane.b32.xlu1 %v1937_v3, %s1863_s4  ;;  %v2035_v30 = vand.u32 15, %v91_v24  ;;  %vm121_vm8 = vcmp.ge.s32.totalorder %v2031_v28, 1  ;;  %vm126_vm12 = vcmp.ge.s32.totalorder %v2033_v29, 1 }
  0x1d   :  { %238 = vrot.lane.b32.xlu2 %v1935_v2, %s1864_s5  ;;  %vm2330_vm0 = vcmp.lt.s32.totalorder %v1993_v12, 15  ;;  %vm2331_vm2 = vcmp.lt.s32.totalorder %v1997_v15, 15  ;;  %vm123_vm6 = vcmp.ge.s32.totalorder %v1993_v12, 1  ;;  %vm124_vm7 = vcmp.ge.s32.totalorder %v1997_v15, 1  ;;  %vm129_vm15 = vmand %vm121_vm8, %vm125_vm9 }
  0x1e   :  { %vm2006_vm3 = vmand %vm2330_vm0, %vm127_vm1  ;;  %vm122_vm11 = vcmp.ge.s32.totalorder %v2035_v30, 1 }
  0x1f   :  { %vm2017_vm5 = vmand %vm2331_vm2, %vm2332_vm4  ;;  %vm146_vm2 = vcmask 64512  }
  0x20   :  { %vm131_vm10 = vmand %vm123_vm6, %vm127_vm1 }
  0x21   :  { %vm132_vm14 = vmand %vm124_vm7, %vm2332_vm4  ;;  %vm242_vm4 = vcmp.lt.s32.totalorder %v1983_v6, 16 }
  0x22   :  { %vm130_vm0 = vmand %vm122_vm11, %vm126_vm12 }
  0x24   :  { %240 = vrot.lane.b32.xlu0 %v1928_v0, %s1864_s5  ;;  %259 = vrot.lane.b32.xlu1 %v1945_v4, %s1865_s19 }
  0x25   :  { %234 = vrot.lane.b32.xlu2 %v1937_v3, %s1864_s5 }
  0x2c   :  { %349 = vrot.lane.b32.xlu0 %v1930_v1, %s1866_s20  ;;  %351 = vrot.lane.b32.xlu1 %v1935_v2, %s1866_s20 }
  0x2d   :  { %353 = vrot.lane.b32.xlu2 %v1928_v0, %s1866_s20 }
  0x34   :  { %380 = vrot.lane.b32.xlu0 %v1945_v4, %s1867_s21  ;;  %347 = vrot.lane.b32.xlu1 %v1937_v3, %s1866_s20 }
  0x35   :  { %470 = vrot.lane.b32.xlu2 %v1930_v1, %s1868_s1 }
  0x3c   :  { %472 = vrot.lane.b32.xlu0 %v1935_v2, %s1868_s1  ;;  %474 = vrot.lane.b32.xlu1 %v1928_v0, %s1868_s1 }
  0x3d   :  { %493 = vrot.lane.b32.xlu2 %v1945_v4, %s1869_s22 }
  0x44   :  { %468 = vrot.lane.b32.xlu0 %v1937_v3, %s1868_s1  ;;  %581 = vrot.lane.b32.xlu1 %v1945_v4, %s1870_s23 }
  0x45   :  { %669 = vrot.lane.b32.xlu2 %v1937_v3, %s1871_s24 }
  0x4c   :  { %673 = vrot.lane.b32.xlu0 %v1935_v2, %s1871_s24  ;;  %675 = vrot.lane.b32.xlu1 %v1928_v0, %s1871_s24 }
  0x4d   :  { %694 = vrot.lane.b32.xlu2 %v1945_v4, %s1872_s25 }
  0x54   :  { %671 = vrot.lane.b32.xlu0 %v1930_v1, %s1871_s24  ;;  %782 = vrot.lane.b32.xlu1 %v1937_v3, %s1873_s26 }
  0x55   :  { %786 = vrot.lane.b32.xlu2 %v1935_v2, %s1873_s26 }
  0x5c   :  { %788 = vrot.lane.b32.xlu0 %v1928_v0, %s1873_s26  ;;  %815 = vrot.lane.b32.xlu1 %v1945_v4, %s1874_s27 }
  0x5d   :  { %784 = vrot.lane.b32.xlu2 %v1930_v1, %s1873_s26 }
  0x64   :  { %903 = vrot.lane.b32.xlu0 %v1937_v3, %s1867_s21  ;;  %907 = vrot.lane.b32.xlu1 %v1935_v2, %s1867_s21 }
  0x65   :  { %909 = vrot.lane.b32.xlu2 %v1928_v0, %s1867_s21 }
  0x6c   :  { %928 = vrot.lane.b32.xlu0 %v1945_v4, %s1875_s28  ;;  %905 = vrot.lane.b32.xlu1 %v1930_v1, %s1867_s21 }
  0x6d   :  { %1016 = vrot.lane.b32.xlu2 %v1937_v3, %s1876_s29 }
  0x6f   :  { %v237_v13 = vpop.permute.xlu2 %236 }
  0x74   :  { %1020 = vrot.lane.b32.xlu0 %v1935_v2, %s1876_s29  ;;  %1022 = vrot.lane.b32.xlu1 %v1928_v0, %s1876_s29 }
  0x75   :  { %1045 = vrot.lane.b32.xlu2 %v1945_v4, %s1877_s30 }
  0x77   :  { %v239_v18 = vpop.permute.xlu2 %238 }
  0x78   :  { %v244_v40 = vsel %vm242_vm4, %v237_v13, %v239_v18 }
  0x7c   :  { %1018 = vrot.lane.b32.xlu0 %v1930_v1, %s1876_s29  ;;  %105 = vperm.xlu1 %1705, %v102_v21  }
  0x7f   :  { %v235_v19 = vpop.permute.xlu2 %234 }
  0x80   :  { %v245_v39 = vsel %vm242_vm4, %v235_v19, %v237_v13 }
  0x86   :  { %v115_v25 = vpop.permute.xlu1 %114  ;;  %v111_v26 = vpop.permute.xlu0 %110 }
  0x87   :  { %v2037_v31 = vpop.permute.xlu2 %353 }
  0x8e   :  { %v113_v32 = vpop.permute.xlu0 %112  ;;  %v109_v33 = vpop.permute.xlu1 %108 }
  0x8f   :  { %v118_v34 = vsel %vm116_vm13, %v111_v26, %v113_v32  ;;  %v117_v35 = vsel %vm116_vm13, %v113_v32, %v115_v25  ;;  %v120_v36 = vsel %vm116_vm13, %v115_v25, %v109_v33  ;;  %v119_v37 = vsel %vm116_vm13, %v109_v33, %v111_v26  ;;  %v471_v38 = vpop.permute.xlu2 %470 }
  0x90   :  { %1585 = vmatpush.msk.msra.mxu2 %vm131_vm10, %v118_v34  ;;  %1587 = vmatpush.msk.msra.mxu3 %vm132_vm14, %v117_v35  ;;  %vm2333_vm10 = vcmp.lt.s32.totalorder %v1995_v14, 15  ;;  %vm355_vm13 = vcmp.lt.s32.totalorder %v1983_v6, 15 }
  0x91   :  { %1581 = vmatpush.msk.msra.mxu0 %vm129_vm15, %v120_v36  ;;  %1583 = vmatpush.msk.msra.mxu1 %vm130_vm0, %v119_v37  ;;  %vm362_vm0 = vcmp.lt.s32.totalorder %v1991_v11, 15  ;;  %vm367_vm14 = vmand %vm124_vm7, %vm2333_vm10  ;;  %vm361_vm15 = vcmp.lt.s32.totalorder %v2033_v29, 15  ;;  %v1138_v36 = vshrl.u32 %v81_v5, 7 }
  0x92   :  { %1582 = vmatmul.msk.f32.vlgmr.msra.gmra.mxu0 %vm146_vm2, %v1945_v4  ;;  %1584 = vmatmul.msk.f32.vlgmr.msra.gmra.mxu1 %vm146_vm2, %v1945_v4  ;;  %vm365_vm10 = vmand %vm122_vm11, %vm361_vm15 }
  0x93   :  { %1586 = vmatmul.msk.f32.vlgmr.msra.gmra.mxu2 %vm146_vm2, %v1945_v4  ;;  %1588 = vmatmul.msk.f32.vlgmr.msra.gmra.mxu3 %vm146_vm2, %v1945_v4  ;;  %v1139_v37 = vadd.s32 8, %v1138_v36 }
  0x94   :  { %1591 = vmatpush.msk.msrb.mxu1 %vm122_vm11, %v245_v39  ;;  %1593 = vmatpush.msk.msrb.mxu2 %vm123_vm6, %v244_v40  ;;  %vm2338_vm11 = vcmp.ge.s32.totalorder %v1995_v14, 1 }
  0x96   :  { %v241_v41 = vpop.permute.xlu0 %240  ;;  %v260_v42 = vpop.permute.xlu1 %259 }
  0x97   :  { %v243_v43 = vsel %vm242_vm4, %v239_v18, %v241_v41  ;;  %v246_v44 = vsel %vm242_vm4, %v241_v41, %v235_v19  ;;  %v494_v45 = vpop.permute.xlu2 %493  ;;  %vm366_vm4 = vmand %vm123_vm6, %vm362_vm0  ;;  %vm360_vm6 = vcmp.lt.s32.totalorder %v2029_v27, 15 }
  0x98   :  { %1595 = vmatpush.msk.msrb.mxu3 %vm124_vm7, %v243_v43  ;;  %1589 = vmatpush.msk.msrb.mxu0 %vm121_vm8, %v246_v44  ;;  %vm364_vm7 = vmand %vm121_vm8, %vm360_vm6  ;;  %vm476_vm8 = vcmp.lt.s32.totalorder %v1983_v6, 1  ;;  %v1164_v43 = vld [vmem:[#allocation5] sm:$0xff] }
  0x9a   :  { %1590 = vmatmul.msk.f32.vlgmr.msrb.gmra.mxu0 %vm146_vm2, %v260_v42  ;;  %1592 = vmatmul.msk.f32.vlgmr.msrb.gmra.mxu1 %vm146_vm2, %v260_v42 }
  0x9b   :  { %1594 = vmatmul.msk.f32.vlgmr.msrb.gmra.mxu2 %vm146_vm2, %v260_v42  ;;  %1596 = vmatmul.msk.f32.vlgmr.msrb.gmra.mxu3 %vm146_vm2, %v260_v42 }
  0x9e   :  { %v350_v46 = vpop.permute.xlu0 %349  ;;  %v352_v47 = vpop.permute.xlu1 %351 }
  0x9f   :  { %v356_v48 = vsel %vm355_vm13, %v352_v47, %v2037_v31  ;;  %v357_v49 = vsel %vm355_vm13, %v350_v46, %v352_v47  ;;  %v670_v50 = vpop.permute.xlu2 %669 }
  0xa0   :  { %1601 = vmatpush.msk.msra.mxu2 %vm366_vm4, %v357_v49  ;;  %1603 = vmatpush.msk.msra.mxu3 %vm367_vm14, %v356_v48  ;;  %vm795_vm4 = vcmp.lt.s32.totalorder %v2031_v28, 15  ;;  %vm790_vm14 = vcmp.lt.s32.totalorder %v1983_v6, 113 }
  0xa6   :  { %v381_v51 = vpop.permute.xlu0 %380  ;;  %v348_v52 = vpop.permute.xlu1 %347 }
  0xa7   :  { %v358_v53 = vsel %vm355_vm13, %v348_v52, %v350_v46  ;;  %v359_v54 = vsel %vm355_vm13, %v2037_v31, %v348_v52  ;;  %1602 = vmatmul.msk.f32.vlgmr.msra.gmra.mxu2 %vm146_vm2, %v381_v51  ;;  %1604 = vmatmul.msk.f32.vlgmr.msra.gmra.mxu3 %vm146_vm2, %v381_v51  ;;  %v695_v59 = vpop.permute.xlu2 %694  ;;  %vm796_vm13 = vcmp.lt.s32.totalorder %v2035_v30, 15 }
  0xa8   :  { %1597 = vmatpush.msk.msra.mxu0 %vm364_vm7, %v359_v54  ;;  %1599 = vmatpush.msk.msra.mxu1 %vm365_vm10, %v358_v53  ;;  %vm2339_vm10 = vcmp.lt.s32.totalorder %v1995_v14, 15  ;;  %vm799_vm7 = vmand %vm795_vm4, %vm125_vm9 }
  0xa9   :  { %1598 = vmatmul.msk.f32.vlgmr.msra.gmra.mxu0 %vm146_vm2, %v381_v51  ;;  %1600 = vmatmul.msk.f32.vlgmr.msra.gmra.mxu1 %vm146_vm2, %v381_v51 }
  0xae   :  { %v473_v55 = vpop.permute.xlu0 %472  ;;  %v475_v56 = vpop.permute.xlu1 %474 }
  0xaf   :  { %v478_v57 = vsel %vm476_vm8, %v471_v38, %v473_v55  ;;  %v477_v58 = vsel %vm476_vm8, %v473_v55, %v475_v56 }
  0xb0   :  { %1609 = vmatpush.msk.msrb.mxu2 %vm127_vm1, %v478_v57  ;;  %1611 = vmatpush.msk.msrb.mxu3 %vm2338_vm11, %v477_v58  ;;  %vm677_vm1 = vcmp.lt.s32.totalorder %v1983_v6, 127 }
  0xb1   :  { %1610 = vmatmul.msk.f32.vlgmr.msrb.gmra.mxu2 %vm146_vm2, %v494_v45  ;;  %1612 = vmatmul.msk.f32.vlgmr.msrb.gmra.mxu3 %vm146_vm2, %v494_v45 }
  0xb2   :  { %640 = vmatpush.msra.mxu2 %v1935_v2  ;;  %660 = vmatpush.msra.mxu3 %v1928_v0  ;;  %v787_v2 = vpop.permute.xlu2 %786 }
  0xb6   :  { %v469_v60 = vpop.permute.xlu0 %468  ;;  %v582_v61 = vpop.permute.xlu1 %581 }
  0xb7   :  { %v479_v62 = vsel %vm476_vm8, %v469_v60, %v471_v38  ;;  %v480_v63 = vsel %vm476_vm8, %v475_v56, %v469_v60  ;;  %vm800_vm8 = vmand %vm796_vm13, %vm126_vm12 }
  0xb8   :  { %1605 = vmatpush.msk.msrb.mxu0 %vm125_vm9, %v480_v63  ;;  %1607 = vmatpush.msk.msrb.mxu1 %vm126_vm12, %v479_v62  ;;  %vm911_vm9 = vcmp.lt.s32.totalorder %v1983_v6, 112  ;;  %vm1024_vm12 = vcmp.lt.s32.totalorder %v1983_v6, 111 }
  0xb9   :  { %1606 = vmatmul.msk.f32.vlgmr.msrb.gmra.mxu0 %vm146_vm2, %v494_v45  ;;  %1608 = vmatmul.msk.f32.vlgmr.msrb.gmra.mxu1 %vm146_vm2, %v494_v45 }
  0xba   :  { %1615 = vmatmul.msk.f32.vlgmr.msra.gmra.mxu2 %vm146_vm2, %v582_v61  ;;  %1616 = vmatmul.msk.f32.vlgmr.msra.gmra.mxu3 %vm146_vm2, %v582_v61 }
  0xbb   :  { %600 = vmatpush.msra.mxu0 %v1937_v3  ;;  %620 = vmatpush.msra.mxu1 %v1930_v1  ;;  %v785_v1 = vpop.permute.xlu2 %784 }
  0xbc   :  { %v792_v18 = vsel %vm790_vm14, %v785_v1, %v787_v2 }
  0xbe   :  { %v674_v0 = vpop.permute.xlu0 %673  ;;  %v676_v4 = vpop.permute.xlu1 %675 }
  0xbf   :  { %v678_v7 = vsel %vm677_vm1, %v674_v0, %v676_v4  ;;  %v681_v8 = vsel %vm677_vm1, %v676_v4, %v670_v50 }
  0xc0   :  { %1621 = vmatpush.msk.msrb.mxu2 %vm362_vm0, %v678_v7  ;;  %1623 = vmatpush.msk.msrb.mxu3 %vm2339_vm10, %v681_v8 }
  0xc1   :  { %1613 = vmatmul.msk.f32.vlgmr.msra.gmra.mxu0 %vm146_vm2, %v582_v61  ;;  %1614 = vmatmul.msk.f32.vlgmr.msra.gmra.mxu1 %vm146_vm2, %v582_v61 }
  0xc2   :  { %1622 = vmatmul.msk.f32.vlgmr.msrb.gmra.mxu2 %vm146_vm2, %v695_v59  ;;  %1624 = vmatmul.msk.f32.vlgmr.msrb.gmra.mxu3 %vm146_vm2, %v695_v59 }
  0xc3   :  { %v910_v24 = vpop.permute.xlu2 %909 }
  0xc6   :  { %v672_v3 = vpop.permute.xlu0 %671  ;;  %v783_v9 = vpop.permute.xlu1 %782 }
  0xc7   :  { %v679_v10 = vsel %vm677_vm1, %v672_v3, %v674_v0  ;;  %v680_v13 = vsel %vm677_vm1, %v670_v50, %v672_v3  ;;  %v793_v19 = vsel %vm790_vm14, %v783_v9, %v785_v1 }
  0xc8   :  { %1617 = vmatpush.msk.msrb.mxu0 %vm360_vm6, %v680_v13  ;;  %1619 = vmatpush.msk.msrb.mxu1 %vm361_vm15, %v679_v10 }
  0xc9   :  { %1618 = vmatmul.msk.f32.vlgmr.msrb.gmra.mxu0 %vm146_vm2, %v695_v59  ;;  %1620 = vmatmul.msk.f32.vlgmr.msrb.gmra.mxu1 %vm146_vm2, %v695_v59 }
  0xca   :  { %1625 = vmatpush.msk.msra.mxu0 %vm799_vm7, %v793_v19  ;;  %1627 = vmatpush.msk.msra.mxu1 %vm800_vm8, %v792_v18 }
  0xcb   :  { %v1017_v31 = vpop.permute.xlu2 %1016 }
  0xce   :  { %v789_v20 = vpop.permute.xlu0 %788  ;;  %v816_v21 = vpop.permute.xlu1 %815 }
  0xcf   :  { %v791_v22 = vsel %vm790_vm14, %v787_v2, %v789_v20  ;;  %v794_v23 = vsel %vm790_vm14, %v789_v20, %v783_v9  ;;  %vm2343_vm14 = vcmp.lt.s32.totalorder %v1995_v14, 15 }
  0xd0   :  { %1629 = vmatpush.msk.msra.mxu2 %vm2006_vm3, %v791_v22  ;;  %1631 = vmatpush.msk.msra.mxu3 %vm2017_vm5, %v794_v23  ;;  %vm2340_vm3 = vcmp.lt.s32.totalorder %v1997_v15, 15  ;;  %vm2341_vm5 = vcmp.lt.s32.totalorder %v1993_v12, 15  ;;  %v1879_v12 = vmov 1.0  }
  0xd1   :  { %1626 = vmatmul.msk.f32.vlgmr.msra.gmra.mxu0 %vm146_vm2, %v816_v21  ;;  %1628 = vmatmul.msk.f32.vlgmr.msra.gmra.mxu1 %vm146_vm2, %v816_v21  ;;  %vm2342_vm11 = vmmov %vm2341_vm5 }
  0xd2   :  { %1630 = vmatmul.msk.f32.vlgmr.msra.gmra.mxu2 %vm146_vm2, %v816_v21  ;;  %1632 = vmatmul.msk.f32.vlgmr.msra.gmra.mxu3 %vm146_vm2, %v816_v21  ;;  %vm1031_vm10 = vmand %vm2342_vm11, %vm362_vm0  ;;  %vm1142_vm0 = vcmp.eq.s32.totalorder %v1138_v36, %v1991_v11  ;;  %vm1143_vm11 = vcmp.eq.s32.totalorder %v1138_v36, %v1995_v14 }
  0xd3   :  { %v1046_v38 = vpop.permute.xlu2 %1045  ;;  %vm2344_vm7 = vmmov %vm2340_vm3 }
  0xd4   :  { %vm1032_vm8 = vmand %vm2344_vm7, %vm2343_vm14 }
  0xd5   :  { %vm1029_vm14 = vmand %vm795_vm4, %vm360_vm6  ;;  %vm1165_vm6 = vcmask 130048  }
  0xd6   :  { %v904_v25 = vpop.permute.xlu0 %903  ;;  %v908_v26 = vpop.permute.xlu1 %907 }
  0xd7   :  { %v915_v16 = vsel %vm911_vm9, %v910_v24, %v904_v25  ;;  %v912_v17 = vsel %vm911_vm9, %v908_v26, %v910_v24 }
  0xd8   :  { %1639 = vmatpush.msk.msrb.mxu3 %vm2340_vm3, %v915_v16  ;;  %1637 = vmatpush.msk.msrb.mxu2 %vm2341_vm5, %v912_v17  ;;  %vm1146_vm3 = vcmp.eq.s32.totalorder %v1139_v37, %v1991_v11  ;;  %vm1147_vm5 = vcmp.eq.s32.totalorder %v1139_v37, %v1995_v14  ;;  %v1249_v11 = vld [vmem:[#allocation7] sm:$0xff] }
  0xde   :  { %v929_v32 = vpop.permute.xlu0 %928  ;;  %v906_v33 = vpop.permute.xlu1 %905 }
  0xdf   :  { %v913_v34 = vsel %vm911_vm9, %v906_v33, %v908_v26  ;;  %v914_v35 = vsel %vm911_vm9, %v904_v25, %v906_v33  ;;  %1638 = vmatmul.msk.f32.vlgmr.msrb.gmra.mxu2 %vm146_vm2, %v929_v32  ;;  %1640 = vmatmul.msk.f32.vlgmr.msrb.gmra.mxu3 %vm146_vm2, %v929_v32 }
  0xe0   :  { %1633 = vmatpush.msk.msrb.mxu0 %vm795_vm4, %v914_v35  ;;  %1635 = vmatpush.msk.msrb.mxu1 %vm796_vm13, %v913_v34  ;;  %vm1145_vm4 = vcmp.eq.s32.totalorder %v1139_v37, %v2033_v29 }
  0xe1   :  { %1634 = vmatmul.msk.f32.vlgmr.msrb.gmra.mxu0 %vm146_vm2, %v929_v32  ;;  %1636 = vmatmul.msk.f32.vlgmr.msrb.gmra.mxu1 %vm146_vm2, %v929_v32 }
  0xe6   :  { %v1021_v5 = vpop.permute.xlu0 %1020  ;;  %v1023_v39 = vpop.permute.xlu1 %1022 }
  0xe7   :  { %v1025_v40 = vsel %vm1024_vm12, %v1021_v5, %v1023_v39  ;;  %v1028_v41 = vsel %vm1024_vm12, %v1023_v39, %v1017_v31 }
  0xe8   :  { %1645 = vmatpush.msk.msra.mxu2 %vm1031_vm10, %v1025_v40  ;;  %1647 = vmatpush.msk.msra.mxu3 %vm1032_vm8, %v1028_v41  ;;  %vm1030_vm10 = vmand %vm796_vm13, %vm361_vm15  ;;  %vm1144_vm15 = vcmp.eq.s32.totalorder %v1139_v37, %v2029_v27  ;;  %vm1140_vm13 = vcmp.eq.s32.totalorder %v1138_v36, %v2029_v27 }
  0xe9   :  { %1646 = vmatmul.msk.f32.vlgmr.msra.gmra.mxu2 %vm146_vm2, %v1046_v38  ;;  %1648 = vmatmul.msk.f32.vlgmr.msra.gmra.mxu3 %vm146_vm2, %v1046_v38 }
  0xea   :  { %1663 = vmatpush.msk.msrb.mxu2 %vm1146_vm3, %v1879_v12  ;;  %1666 = vmatpush.msk.msrb.mxu3 %vm1147_vm5, %v1879_v12 }
  0xec   :  { %1664 = vmatpush.msk.msrb.mxu2 %vm1142_vm0, %v1879_v12  ;;  %1667 = vmatpush.msk.msrb.mxu3 %vm1143_vm11, %v1879_v12 }
  0xee   :  { %1675 = vmatpush.msk.msra.mxu2 %vm1146_vm3, %v1879_v12  ;;  %1678 = vmatpush.msk.msra.mxu3 %vm1147_vm5, %v1879_v12  ;;  %v1019_v15 = vpop.permute.xlu0 %1018  ;;  %v106_v8 = vpop.permute.xlu1 %105 }
  0xef   :  { %v1026_v28 = vsel %vm1024_vm12, %v1019_v15, %v1021_v5  ;;  %v1027_v42 = vsel %vm1024_vm12, %v1017_v31, %v1019_v15  ;;  %vm1141_vm12 = vcmp.eq.s32.totalorder %v1138_v36, %v2033_v29 }
  0xf0   :  { %1676 = vmatpush.msk.msra.mxu2 %vm1142_vm0, %v1879_v12  ;;  %1679 = vmatpush.msk.msra.mxu3 %vm1143_vm11, %v1879_v12 }
  0xf1   :  { %1641 = vmatpush.msk.msra.mxu0 %vm1029_vm14, %v1027_v42  ;;  %1643 = vmatpush.msk.msra.mxu1 %vm1030_vm10, %v1026_v28 }
  0xf2   :  { %1642 = vmatmul.msk.f32.vlgmr.msra.gmra.mxu0 %vm146_vm2, %v1046_v38  ;;  %1644 = vmatmul.msk.f32.vlgmr.msra.gmra.mxu1 %vm146_vm2, %v1046_v38  ;;  %vm1520_vm2 = vcmp.ge.s32.totalorder %v1983_v6, 64 }
  0xf3   :  { %1665 = vmatmul.msk.f32.vlgmr.msrb.gmra.mxu2 %vm1165_vm6, %v1164_v43  ;;  %1668 = vmatmul.msk.f32.vlgmr.msrb.gmra.mxu3 %vm1165_vm6, %v1164_v43 }
  0xf4   :  { %1657 = vmatpush.msk.msrb.mxu0 %vm1144_vm15, %v1879_v12  ;;  %1660 = vmatpush.msk.msrb.mxu1 %vm1145_vm4, %v1879_v12 }
  0xf6   :  { %1658 = vmatpush.msk.msrb.mxu0 %vm1140_vm13, %v1879_v12  ;;  %1661 = vmatpush.msk.msrb.mxu1 %vm1141_vm12, %v1879_v12 }
  0xf8   :  { %1669 = vmatpush.msk.msra.mxu0 %vm1144_vm15, %v1879_v12  ;;  %1672 = vmatpush.msk.msra.mxu1 %vm1145_vm4, %v1879_v12 }
  0xfa   :  { %1670 = vmatpush.msk.msra.mxu0 %vm1140_vm13, %v1879_v12  ;;  %1673 = vmatpush.msk.msra.mxu1 %vm1141_vm12, %v1879_v12 }
  0xfb   :  { %1659 = vmatmul.msk.f32.vlgmr.msrb.gmra.mxu0 %vm1165_vm6, %v1164_v43  ;;  %1662 = vmatmul.msk.f32.vlgmr.msrb.gmra.mxu1 %vm1165_vm6, %v1164_v43 }
  0xfc   :  { %1677 = vmatmul.msk.f32.vlgmr.msra.gmra.mxu2 %vm1165_vm6, %v1249_v11  ;;  %1680 = vmatmul.msk.f32.vlgmr.msra.gmra.mxu3 %vm1165_vm6, %v1249_v11 }
 0x103   :  { %1671 = vmatmul.msk.f32.vlgmr.msra.gmra.mxu0 %vm1165_vm6, %v1249_v11  ;;  %1674 = vmatmul.msk.f32.vlgmr.msra.gmra.mxu1 %vm1165_vm6, %v1249_v11 }
 0x10f   :  { %v167_v29 = vpop.f32.mrf.mxu0  ;;  %v187_v30 = vpop.f32.mrf.mxu1 }
 0x110   :  { %v230_v9 = vadd.f32 %v167_v29, %v106_v8  ;;  %v231_v10 = vadd.f32 %v187_v30, %v106_v8 }
 0x116   :  { %v207_v14 = vpop.f32.mrf.mxu2  ;;  %v227_v27 = vpop.f32.mrf.mxu3 }
 0x117   :  { %v280_v46 = vpop.f32.mrf.mxu0  ;;  %v300_v47 = vpop.f32.mrf.mxu1  ;;  %v232_v13 = vadd.f32 %v207_v14, %v106_v8  ;;  %v233_v18 = vadd.f32 %v227_v27, %v106_v8 }
 0x118   :  { %v343_v21 = vadd.f32 %v280_v46, %v230_v9  ;;  %v344_v22 = vadd.f32 %v300_v47, %v231_v10  ;;  %v1388_v10 = vld [vmem:[#allocation8 + $0x78] sm:$0xff] }
 0x119   :  { %1437 = vmatpush.msrb.mxu0 %v1388_v10  ;;  %v1410_v10 = vld [vmem:[#allocation8 + $0x128] sm:$0xff] }
 0x11e   :  { %v320_v44 = vpop.f32.mrf.mxu2  ;;  %v340_v45 = vpop.f32.mrf.mxu3 }
 0x11f   :  { %v345_v23 = vadd.f32 %v320_v44, %v232_v13  ;;  %v346_v24 = vadd.f32 %v340_v45, %v233_v18  ;;  %v1387_v13 = vld [vmem:[#allocation8 + $0x70] sm:$0xff]  ;;  %v1386_v18 = vld [vmem:[#allocation8 + $0x68] sm:$0xff] }
 0x120   :  { %1438 = vmatpush.msrb.mxu0 %v1387_v13  ;;  %v1426_v13 = vld [vmem:[#allocation8 + $0x1a8] sm:$0xff] }
 0x122   :  { %1439 = vmatpush.msrb.mxu0 %v1386_v18  ;;  %v1393_v18 = vld [vmem:[#allocation8 + $0xa0] sm:$0xff] }
 0x126   :  { %v401_v50 = vpop.f32.mrf.mxu0  ;;  %v421_v51 = vpop.f32.mrf.mxu1 }
 0x127   :  { %v464_v25 = vadd.f32 %v401_v50, %v343_v21  ;;  %v465_v26 = vadd.f32 %v421_v51, %v344_v22  ;;  %v1420_v21 = vld [vmem:[#allocation8 + $0x178] sm:$0xff] }
 0x128   :  { %v1436_v22 = vld [vmem:[#allocation8 + $0x1f8] sm:$0xff]  ;;  %1477 = vmatpush.msrb.mxu2 %v1420_v21 }
 0x129   :  { %1497 = vmatpush.msrb.mxu3 %v1436_v22  ;;  %v1392_v21 = vld [vmem:[#allocation8 + $0x98] sm:$0xff] }
 0x12a   :  { %v441_v48 = vpop.f32.mrf.mxu2  ;;  %v461_v49 = vpop.f32.mrf.mxu3  ;;  %v1408_v22 = vld [vmem:[#allocation8 + $0x118] sm:$0xff] }
 0x12b   :  { %v466_v16 = vadd.f32 %v441_v48, %v345_v23  ;;  %v467_v17 = vadd.f32 %v461_v49, %v346_v24  ;;  %v1384_v23 = vld [vmem:[#allocation8 + $0x58] sm:$0xff]  ;;  %v1383_v24 = vld [vmem:[#allocation8 + $0x50] sm:$0xff] }
 0x134   :  { %v554_v52 = vpop.f32.mrf.mxu2  ;;  %v574_v53 = vpop.f32.mrf.mxu3 }
 0x135   :  { %v579_v33 = vadd.f32 %v554_v52, %v466_v16  ;;  %v580_v34 = vadd.f32 %v574_v53, %v467_v17  ;;  %v1380_v16 = vld [vmem:[#allocation8 + $0x38] sm:$0xff]  ;;  %v1379_v17 = vld [vmem:[#allocation8 + $0x30] sm:$0xff] }
 0x136   :  { %v514_v54 = vpop.f32.mrf.mxu0  ;;  %v534_v55 = vpop.f32.mrf.mxu1 }
 0x137   :  { %v577_v35 = vadd.f32 %v514_v54, %v464_v25  ;;  %v578_v36 = vadd.f32 %v534_v55, %v465_v26  ;;  %v1382_v25 = vld [vmem:[#allocation8 + $0x48] sm:$0xff]  ;;  %v1381_v26 = vld [vmem:[#allocation8 + $0x40] sm:$0xff] }
 0x13d   :  { %v642_v56 = vpop.f32.mrf.mxu2  ;;  %v662_v57 = vpop.f32.mrf.mxu3 }
 0x13e   :  { %v602_v58 = vpop.f32.mrf.mxu0  ;;  %v622_v59 = vpop.f32.mrf.mxu1  ;;  %v667_v5 = vadd.f32 %v642_v56, %v579_v33  ;;  %v668_v39 = vadd.f32 %v662_v57, %v580_v34  ;;  %v1376_v34 = vld [vmem:[#allocation8 + $0x18] sm:$0xff] }
 0x13f   :  { %v665_v40 = vadd.f32 %v602_v58, %v577_v35  ;;  %v666_v41 = vadd.f32 %v622_v59, %v578_v36 }
 0x145   :  { %v755_v60 = vpop.f32.mrf.mxu2  ;;  %v775_v61 = vpop.f32.mrf.mxu3 }
 0x146   :  { %v715_v62 = vpop.f32.mrf.mxu0  ;;  %v735_v63 = vpop.f32.mrf.mxu1  ;;  %v780_v12 = vadd.f32 %v755_v60, %v667_v5  ;;  %v781_v15 = vadd.f32 %v775_v61, %v668_v39 }
 0x147   :  { %v778_v28 = vadd.f32 %v715_v62, %v665_v40  ;;  %v779_v42 = vadd.f32 %v735_v63, %v666_v41 }
 0x14e   :  { %v836_v4 = vpop.f32.mrf.mxu0  ;;  %v856_v7 = vpop.f32.mrf.mxu1 }
 0x14f   :  { %v899_v43 = vadd.f32 %v836_v4, %v778_v28  ;;  %v900_v11 = vadd.f32 %v856_v7, %v779_v42 }
 0x155   :  { %v876_v2 = vpop.f32.mrf.mxu2  ;;  %v896_v0 = vpop.f32.mrf.mxu3 }
 0x156   :  { %v901_v14 = vadd.f32 %v876_v2, %v780_v12  ;;  %v902_v27 = vadd.f32 %v896_v0, %v781_v15 }
 0x15e   :  { %v949_v19 = vpop.f32.mrf.mxu0  ;;  %v969_v20 = vpop.f32.mrf.mxu1 }
 0x15f   :  { %v1012_v29 = vadd.f32 %v949_v19, %v899_v43  ;;  %v1013_v30 = vadd.f32 %v969_v20, %v900_v11  ;;  %v1385_v19 = vld [vmem:[#allocation8 + $0x60] sm:$0xff]  ;;  %v1404_v20 = vld [vmem:[#allocation8 + $0xf8] sm:$0xff] }
 0x160   :  { %1457 = vmatpush.msrb.mxu1 %v1404_v20  ;;  %1440 = vmatpush.msrb.mxu0 %v1385_v19  ;;  %v1409_v19 = vld [vmem:[#allocation8 + $0x120] sm:$0xff] }
 0x161   :  { %v1425_v20 = vld [vmem:[#allocation8 + $0x1a0] sm:$0xff] }
 0x162   :  { %v989_v1 = vpop.f32.mrf.mxu2  ;;  %v1009_v3 = vpop.f32.mrf.mxu3  ;;  %1441 = vmatpush.msrb.mxu0 %v1384_v23  ;;  %v1424_v23 = vld [vmem:[#allocation8 + $0x198] sm:$0xff] }
 0x163   :  { %v1014_v44 = vadd.f32 %v989_v1, %v901_v14  ;;  %v1015_v45 = vadd.f32 %v1009_v3, %v902_v27  ;;  %v1375_v27 = vld [vmem:[#allocation8 + $0x10] sm:$0xff] }
 0x164   :  { %1442 = vmatpush.msrb.mxu0 %v1383_v24  ;;  %v1391_v24 = vld [vmem:[#allocation8 + $0x90] sm:$0xff] }
 0x166   :  { %1443 = vmatpush.msrb.mxu0 %v1382_v25  ;;  %v1407_v25 = vld [vmem:[#allocation8 + $0x110] sm:$0xff] }
 0x168   :  { %1444 = vmatpush.msrb.mxu0 %v1381_v26  ;;  %v1423_v26 = vld [vmem:[#allocation8 + $0x190] sm:$0xff] }
 0x16a   :  { %1445 = vmatpush.msrb.mxu0 %v1380_v16  ;;  %v1390_v16 = vld [vmem:[#allocation8 + $0x88] sm:$0xff] }
 0x16c   :  { %v1106_v31 = vpop.f32.mrf.mxu2  ;;  %v1126_v32 = vpop.f32.mrf.mxu3  ;;  %1446 = vmatpush.msrb.mxu0 %v1379_v17  ;;  %v1406_v17 = vld [vmem:[#allocation8 + $0x108] sm:$0xff] }
 0x16d   :  { %v1131_v50 = vadd.f32 %v1106_v31, %v1014_v44  ;;  %v1132_v51 = vadd.f32 %v1126_v32, %v1015_v45  ;;  %v1378_v31 = vld [vmem:[#allocation8 + $0x28] sm:$0xff]  ;;  %v1377_v32 = vld [vmem:[#allocation8 + $0x20] sm:$0xff]  ;;  %v1435_v44 = vld [vmem:[#allocation8 + $0x1f0] sm:$0xff] }
 0x16e   :  { %1447 = vmatpush.msrb.mxu0 %v1378_v31  ;;  %v1374_v45 = vld [vmem:[#allocation8 + $0x8] sm:$0xff]  ;;  %1498 = vmatpush.msrb.mxu3 %v1435_v44 }
 0x16f   :  { %v1066_v37 = vpop.f32.mrf.mxu0  ;;  %v1086_v38 = vpop.f32.mrf.mxu1  ;;  %v1135_v54 = vmax.f32 %v1131_v50, 0.0  ;;  %v1136_v55 = vmax.f32 %v1132_v51, 0.0  ;;  %v1401_v50 = vld [vmem:[#allocation8 + $0xe0] sm:$0xff]  ;;  %v1422_v31 = vld [vmem:[#allocation8 + $0x188] sm:$0xff] }
 0x170   :  { %v1129_v52 = vadd.f32 %v1066_v37, %v1012_v29  ;;  %v1130_v53 = vadd.f32 %v1086_v38, %v1013_v30  ;;  %1448 = vmatpush.msrb.mxu0 %v1377_v32  ;;  %v1403_v29 = vld [vmem:[#allocation8 + $0xf0] sm:$0xff]  ;;  %v1417_v51 = vld [vmem:[#allocation8 + $0x160] sm:$0xff] }
 0x171   :  { %v1419_v30 = vld [vmem:[#allocation8 + $0x170] sm:$0xff]  ;;  %1458 = vmatpush.msrb.mxu1 %v1403_v29  ;;  %v1389_v32 = vld [vmem:[#allocation8 + $0x80] sm:$0xff] }
 0x172   :  { %v1133_v56 = vmax.f32 %v1129_v52, 0.0  ;;  %v1134_v57 = vmax.f32 %v1130_v53, 0.0  ;;  %1449 = vmatpush.msrb.mxu0 %v1376_v34  ;;  %1478 = vmatpush.msrb.mxu2 %v1419_v30  ;;  %v1433_v52 = vld [vmem:[#allocation8 + $0x1e0] sm:$0xff]  ;;  %v1400_v53 = vld [vmem:[#allocation8 + $0xd8] sm:$0xff] }
 0x173   :  { %v1421_v34 = vld [vmem:[#allocation8 + $0x180] sm:$0xff] }
 0x174   :  { %1450 = vmatpush.msrb.mxu0 %v1375_v27 }
 0x176   :  { %v1226_v46 = vpop.f32.mrf.mxu2  ;;  %v1246_v47 = vpop.f32.mrf.mxu3  ;;  %1451 = vmatpush.msrb.mxu0 %v1374_v45 }
 0x177   :  { %v1335_v58 = vmul.f32 %v1226_v46, %v1135_v54  ;;  %v1336_v59 = vmul.f32 %v1246_v47, %v1136_v55  ;;  %v1402_v46 = vld [vmem:[#allocation8 + $0xe8] sm:$0xff]  ;;  %v1416_v54 = vld [vmem:[#allocation8 + $0x158] sm:$0xff] }
 0x178   :  { %v1186_v48 = vpop.f32.mrf.mxu0  ;;  %v1206_v49 = vpop.f32.mrf.mxu1  ;;  %v1418_v47 = vld [vmem:[#allocation8 + $0x168] sm:$0xff]  ;;  %1459 = vmatpush.msrb.mxu1 %v1402_v46  ;;  %v1432_v55 = vld [vmem:[#allocation8 + $0x1d8] sm:$0xff] }
 0x179   :  { %v1333_v60 = vmul.f32 %v1186_v48, %v1133_v56  ;;  %v1334_v61 = vmul.f32 %v1206_v49, %v1134_v57  ;;  %v1434_v48 = vld [vmem:[#allocation8 + $0x1e8] sm:$0xff]  ;;  %v1373_v49 = vld [vmem:[#allocation8] sm:$0xff]  ;;  %1479 = vmatpush.msrb.mxu2 %v1418_v47  ;;  %v1399_v56 = vld [vmem:[#allocation8 + $0xd0] sm:$0xff] }
 0x17a   :  { %1499 = vmatpush.msrb.mxu3 %v1434_v48  ;;  %1452 = vmatpush.msrb.mxu0 %v1373_v49  ;;  %v1415_v57 = vld [vmem:[#allocation8 + $0x150] sm:$0xff] }
 0x17b   :  { %1460 = vmatpush.msrb.mxu1 %v1401_v50  ;;  %1480 = vmatpush.msrb.mxu2 %v1417_v51 }
 0x17c   :  { %1500 = vmatpush.msrb.mxu3 %v1433_v52 }
 0x17d   :  { %1461 = vmatpush.msrb.mxu1 %v1400_v53  ;;  %1481 = vmatpush.msrb.mxu2 %v1416_v54 }
 0x17e   :  { %1501 = vmatpush.msrb.mxu3 %v1432_v55 }
 0x17f   :  { %v1310_v62 = vpop.f32.mrf.mxu2  ;;  %v1330_v63 = vpop.f32.mrf.mxu3  ;;  %1462 = vmatpush.msrb.mxu1 %v1399_v56  ;;  %1482 = vmatpush.msrb.mxu2 %v1415_v57 }
 0x180   :  { %v1270_v2 = vpop.f32.mrf.mxu0  ;;  %v1290_v0 = vpop.f32.mrf.mxu1  ;;  %v1339_v4 = vadd.f32 %v1335_v58, %v1310_v62  ;;  %v1340_v7 = vadd.f32 %v1336_v59, %v1330_v63  ;;  %v1431_v58 = vld [vmem:[#allocation8 + $0x1d0] sm:$0xff]  ;;  %v1398_v59 = vld [vmem:[#allocation8 + $0xc8] sm:$0xff]  ;;  %v1397_v62 = vld [vmem:[#allocation8 + $0xc0] sm:$0xff] }
 0x181   :  { %v1337_v8 = vadd.f32 %v1333_v60, %v1270_v2  ;;  %v1338_v1 = vadd.f32 %v1334_v61, %v1290_v0  ;;  %v1414_v60 = vld [vmem:[#allocation8 + $0x148] sm:$0xff]  ;;  %1502 = vmatpush.msrb.mxu3 %v1431_v58  ;;  %1463 = vmatpush.msrb.mxu1 %v1398_v59  ;;  %v1413_v63 = vld [vmem:[#allocation8 + $0x140] sm:$0xff]  ;;  %v1396_v0 = vld [vmem:[#allocation8 + $0xb8] sm:$0xff] }
 0x182   :  { %v1430_v61 = vld [vmem:[#allocation8 + $0x1c8] sm:$0xff]  ;;  %v1429_v2 = vld [vmem:[#allocation8 + $0x1c0] sm:$0xff]  ;;  %1483 = vmatpush.msrb.mxu2 %v1414_v60 }
 0x183   :  { %v1706_v3 = vpack.i.bf16 %v1339_v4, %v1337_v8  ;;  %v1711_v9 = vpack.i.bf16 %v1338_v1, %v1340_v7  ;;  %1503 = vmatpush.msrb.mxu3 %v1430_v61  ;;  %1464 = vmatpush.msrb.mxu1 %v1397_v62 }
 0x184   :  { %1484 = vmatpush.msrb.mxu2 %v1413_v63 }
 0x185   :  { %1712 = vrot.lane.b32.xlu0 %v1711_v9, %s1871_s24  ;;  %1707 = vrot.lane.b32.xlu2 %v1706_v3, %s1871_s24  ;;  %v1427_v3 = vld [vmem:[#allocation8 + $0x1b0] sm:$0xff]  ;;  %v1394_v9 = vld [vmem:[#allocation8 + $0xa8] sm:$0xff] }
 0x186   :  { %1504 = vmatpush.msrb.mxu3 %v1429_v2  ;;  %1465 = vmatpush.msrb.mxu1 %v1396_v0 }
 0x1df   :  { %v1708_v33 = vpop.permute.xlu2 %1707 }
 0x1e0   :  { %v1710_v36 = vunpack.i.h.bf16 %v1708_v33  ;;  %v1709_v37 = vunpack.i.l.bf16 %v1708_v33  ;;  %v1405_v33 = vld [vmem:[#allocation8 + $0x100] sm:$0xff] }
 0x1f7   :  { %v1713_v35 = vpop.permute.xlu0 %1712 }
 0x1f8   :  { %v1715_v38 = vunpack.i.h.bf16 %v1713_v35  ;;  %v1714_v5 = vunpack.i.l.bf16 %v1713_v35 }
 0x1fa   :  { %v1349_v39 = vsel %vm677_vm1, %v1710_v36, %v1714_v5  ;;  %v1350_v40 = vsel %vm677_vm1, %v1715_v38, %v1710_v36  ;;  %v1351_v41 = vsel %vm677_vm1, %v1709_v37, %v1715_v38  ;;  %v1352_v12 = vsel %vm677_vm1, %v1714_v5, %v1709_v37 }
 0x1fb   :  { %v2276_v15 = vmax.f32 %v1339_v4, %v1349_v39  ;;  %v2278_v28 = vmax.f32 %v1340_v7, %v1352_v12  ;;  %v2280_v42 = vmax.f32 %v1337_v8, %v1351_v41  ;;  %v2282_v43 = vmax.f32 %v1338_v1, %v1350_v40  ;;  %v1412_v4 = vld [vmem:[#allocation8 + $0x138] sm:$0xff]  ;;  %v1395_v8 = vld [vmem:[#allocation8 + $0xb0] sm:$0xff] }
 0x1fc   :  { %v1428_v7 = vld [vmem:[#allocation8 + $0x1b8] sm:$0xff]  ;;  %v1411_v1 = vld [vmem:[#allocation8 + $0x130] sm:$0xff]  ;;  %1485 = vmatpush.msrb.mxu2 %v1412_v4  ;;  %1466 = vmatpush.msrb.mxu1 %v1395_v8  ;;  %vm1518_vm1 = vcmp.lt.s32.totalorder %v1983_v6, 64 }
 0x1fd   :  { %v1716_v11 = vpack.i.bf16 %v2278_v28, %v2276_v15  ;;  %v1721_v14 = vpack.i.bf16 %v2282_v43, %v2280_v42  ;;  %1505 = vmatpush.msrb.mxu3 %v1428_v7 }
 0x1fe   :  { %1486 = vmatpush.msrb.mxu2 %v1411_v1  ;;  %1467 = vmatpush.msrb.mxu1 %v1394_v9 }
 0x1ff   :  { %1717 = vrot.lane.b32.xlu1 %v1716_v11, %s1867_s21  ;;  %1722 = vrot.lane.b32.xlu2 %v1721_v14, %s1867_s21 }
 0x200   :  { %1506 = vmatpush.msrb.mxu3 %v1427_v3  ;;  %1487 = vmatpush.msrb.mxu2 %v1410_v10 }
 0x201   :  { %1468 = vmatpush.msrb.mxu1 %v1393_v18 }
 0x202   :  { %1507 = vmatpush.msrb.mxu3 %v1426_v13  ;;  %1488 = vmatpush.msrb.mxu2 %v1409_v19 }
 0x203   :  { %1469 = vmatpush.msrb.mxu1 %v1392_v21 }
 0x204   :  { %1508 = vmatpush.msrb.mxu3 %v1425_v20  ;;  %1489 = vmatpush.msrb.mxu2 %v1408_v22 }
 0x205   :  { %1470 = vmatpush.msrb.mxu1 %v1391_v24 }
 0x206   :  { %1509 = vmatpush.msrb.mxu3 %v1424_v23  ;;  %1490 = vmatpush.msrb.mxu2 %v1407_v25 }
 0x207   :  { %1471 = vmatpush.msrb.mxu1 %v1390_v16 }
 0x208   :  { %1510 = vmatpush.msrb.mxu3 %v1423_v26  ;;  %1491 = vmatpush.msrb.mxu2 %v1406_v17 }
 0x209   :  { %1472 = vmatpush.msrb.mxu1 %v1389_v32 }
 0x20a   :  { %1511 = vmatpush.msrb.mxu3 %v1422_v31  ;;  %1492 = vmatpush.msrb.mxu2 %v1405_v33 }
 0x20c   :  { %1512 = vmatpush.msrb.mxu3 %v1421_v34 }
 0x259   :  { %v1723_v35 = vpop.permute.xlu2 %1722 }
 0x25a   :  { %v1725_v36 = vunpack.i.h.bf16 %v1723_v35  ;;  %v1724_v37 = vunpack.i.l.bf16 %v1723_v35 }
 0x25c   :  { %v1367_v38 = vsel %vm911_vm9, %v1724_v37, %v1725_v36 }
 0x25d   :  { %v1369_v5 = vmax.f32 %v2280_v42, %v1367_v38 }
 0x25f   :  { %1453 = vmatmul.f32.vlgmr.msrb.gmra.mxu0 %v1369_v5 }
 0x271   :  { %v1718_v39 = vpop.permute.xlu1 %1717 }
 0x272   :  { %v1720_v40 = vunpack.i.h.bf16 %v1718_v39  ;;  %v1719_v41 = vunpack.i.l.bf16 %v1718_v39 }
 0x274   :  { %v1365_v12 = vsel %vm911_vm9, %v1719_v41, %v1720_v40  ;;  %v1366_v11 = vsel %vm911_vm9, %v1725_v36, %v1719_v41  ;;  %v1368_v14 = vsel %vm911_vm9, %v1720_v40, %v1724_v37 }
 0x275   :  { %v1370_v27 = vmax.f32 %v2282_v43, %v1366_v11  ;;  %v1371_v29 = vmax.f32 %v2276_v15, %v1365_v12  ;;  %v1372_v30 = vmax.f32 %v2278_v28, %v1368_v14 }
 0x277   :  { %1473 = vmatmul.f32.vlgmr.msrb.gmra.mxu1 %v1370_v27  ;;  %1493 = vmatmul.f32.vlgmr.msrb.gmra.mxu2 %v1371_v29 }
 0x278   :  { %1513 = vmatmul.f32.vlgmr.msrb.gmra.mxu3 %v1372_v30 }
 0x2dc   :  { %v1454_v44 = vpop.f32.mrf.mxu0 }
 0x2f4   :  { %v1474_v42 = vpop.f32.mrf.mxu1 }
 0x2f5   :  { %v1475_v45 = vadd.f32 %v1474_v42, %v1454_v44 }
 0x2fa   :  { %v1494_v46 = vpop.f32.mrf.mxu2 }
 0x2fb   :  { %v1495_v47 = vadd.f32 %v1494_v46, %v1475_v45  ;;  %v1514_v48 = vpop.f32.mrf.mxu3 }
 0x2fd   :  { %v1515_v49 = vadd.f32 %v1514_v48, %v1495_v47 }
 0x2ff   :  { %v1532_v43 = vsel %vm1520_vm2, %v1515_v49, 0.0  ;;  %v1525_v15 = vsel %vm1518_vm1, %v1515_v49, 0.0 }
 0x300   :  { %1533 = vadd.xlane.f32.xlu1 %v1532_v43  ;;  %1526 = vadd.xlane.f32.xlu0 %v1525_v15 }
 0x373   :  { %v1534_v28 = vpop.xlane.xlu1 %1533  ;;  %v1527_v50 = vpop.xlane.xlu0 %1526 }
 0x374   :  { %v1535_v51 = vmul.f32 0.015625, %v1534_v28  ;;  %v1528_v52 = vmul.f32 0.015625, %v1527_v50 }
 0x376   :  { %v1529_v53 = vsel %vm1518_vm1, %v1528_v52, 0.0 }
 0x377   :  { %v1536_v54 = vsel %vm1520_vm2, %v1535_v51, %v1529_v53 }
 0x378   :  { %v1537_v55 = vsub.f32 %v1515_v49, %v1536_v54 }
 0x37a   :  { %v1538_v56 = vmul.f32 %v1537_v55, %v1537_v55 }
 0x37c   :  { %v1539_v57 = vsel %vm1518_vm1, %v1538_v56, 0.0  ;;  %v1544_v58 = vsel %vm1520_vm2, %v1538_v56, 0.0 }
 0x37d   :  { %1540 = vadd.xlane.f32.xlu2 %v1539_v57 }
 0x385   :  { %1545 = vadd.xlane.f32.xlu2 %v1544_v58 }
 0x3f0   :  { %v1541_v59 = vpop.xlane.xlu2 %1540 }
 0x3f1   :  { %v1542_v60 = vmul.f32 0.015625, %v1541_v59 }
 0x3f3   :  { %v1543_v63 = vsel %vm1518_vm1, %v1542_v60, 0.0 }
 0x3f8   :  { %v1546_v61 = vpop.xlane.xlu2 %1545 }
 0x3f9   :  { %v1547_v62 = vmul.f32 0.015625, %v1546_v61 }
 0x3fb   :  { %v1548_v2 = vsel %vm1520_vm2, %v1547_v62, %v1543_v63 }
 0x3fc   :  { %v1549_v0 = vadd.f32 1e-05, %v1548_v2 }
 0x3fe   :  { %1727 = vrsqrt.f32 %v1549_v0  ;;  %vm1556_vm7 = vweird.f32 %v1549_v0 }
 0x404   :  { %v1728_v4 = vpop.eup %1727 }
 0x405   :  { %v1551_v7 = vmul.f32 %v1728_v4, %v1549_v0  ;;  %vm1557_vm9 = vweird.f32 %v1728_v4 }
 0x406   :  { %vm1558_vm8 = vmor %vm1556_vm7, %vm1557_vm9 }
 0x407   :  { %v1552_v8 = vmul.f32 %v1728_v4, %v1551_v7 }
 0x409   :  { %v1553_v1 = vmul.f32 0.5, %v1552_v8 }
 0x40b   :  { %v1554_v3 = vsub.f32 1.5, %v1553_v1 }
 0x40d   :  { %v1555_v9 = vmul.f32 %v1728_v4, %v1554_v3 }
 0x40f   :  { %v1559_v10 = vsel %vm1558_vm8, %v1728_v4, %v1555_v9 }
 0x410   :  { %v1560_v6 = vmul.f32 %v1559_v10, %v1537_v55 }
 0x412   :  { %1561 = vst [vmem:[#allocation10] sm:$0xff] %v1560_v6 }
 0x413   :  { %1572 = dma.vmem_to_hbm [thread:$0]  %s1568_s9, 128, %s1570_s11, [#allocation4]  }
 0x414   :  { %1855 = dma.done.wait [#allocation4], 128  }
 0x415   :  { %1856 = vsyncadd [#allocation4], 4294967168 }
 0x416   :  { %1577 = vsyncpa [#allocation3], 1 }
 0x417   :  { %1578 = vsyncpa [#allocation6], 1 }
 0x418   :  { %1579 = vsyncpa [#allocation9], 1 }
 0x419   :  { %1580 = vsyncpa [#allocation4], 1 }

</bundles_post_ra>
